<compile_context>
chip_gen: v6e
topology: v6e:2x2x1
jax: 0.10.0
libtpu: 0.0.40
codegen_flags: <defaults>
</compile_context>

<pallas_src>
import functools

import jax
import jax.numpy as jnp
from jax.experimental import pallas as pl
from jax.experimental.pallas import tpu as pltpu


def _window_attn_kernel(x_ref, wqkv_ref, bqkv_ref, bias_ref, wproj_ref,
                        bproj_ref, o_ref, *, num_heads, nW, tokens):
    # x_ref:     (M, C) with M = Bw * N   (Bw windows per grid step, Bw % nW == 0)
    # wqkv_ref:  (C, 3C) bf16             (q columns pre-scaled by head_dim**-0.5)
    # bqkv_ref:  (1, 3C) f32              (q part pre-scaled)
    # bias_ref:  (nW, H, N, N) f32        rel-pos bias (+ additive mask) per window slot
    # wproj_ref: (C, C) bf16, bproj_ref: (1, C) f32
    M, C = x_ref.shape
    N = tokens
    Bw = M // N
    H = num_heads
    hd = C // H
    rep = Bw // nW

    # Fused QKV projection: one (M, C) @ (C, 3C) MXU matmul, bf16 operands,
    # f32 accumulation.
    x = x_ref[...].astype(jnp.bfloat16)
    qkv = jnp.dot(x, wqkv_ref[...],
                  preferred_element_type=jnp.float32) + bqkv_ref[0]   # (M, 3C) f32
    qkv_b = qkv.astype(jnp.bfloat16)

    bias = bias_ref[...]                                              # (nW, H, N, N)

    pv_heads = []
    for h in range(H):
        # Static lane slices (cheap); leading-dim reshapes are free.
        q_h = qkv_b[:, h * hd:(h + 1) * hd].reshape(Bw, N, hd)
        k_h = qkv_b[:, C + h * hd:C + (h + 1) * hd].reshape(Bw, N, hd)
        v_h = qkv_b[:, 2 * C + h * hd:2 * C + (h + 1) * hd].reshape(Bw, N, hd)

        # Window-batched attention scores (single leading batch dim).
        s = jnp.einsum("bnd,bmd->bnm", q_h, k_h,
                       preferred_element_type=jnp.float32)            # (Bw, N, N)

        # Window i of this block uses bias/mask slot i % nW.  This is only
        # correct because block_windows % nW == 0 and every block offset is a
        # multiple of nW -- the wrapper enforces it; keep that invariant.
        s = (s.reshape(rep, nW, N, N) + bias[:, h][None]).reshape(Bw, N, N)

        # Numerically-stable softmax in f32; approx reciprocal goes to the
        # EUP slot (~1e-3 rel error on the denominator -- use an exact divide
        # for training / tight-accuracy inference).
        s = s - jnp.max(s, axis=-1, keepdims=True)
        e = jnp.exp(s)
        p = e * pl.reciprocal(jnp.sum(e, axis=-1, keepdims=True), approx=True)

        pv = jnp.einsum("bnm,bmd->bnd", p.astype(jnp.bfloat16), v_h,
                        preferred_element_type=jnp.float32)           # (Bw, N, hd)
        pv_heads.append(pv.reshape(M, hd))

    # Head concat (lane placement only) + ONE (M, C) @ (C, C) projection
    # instead of H separate K=hd accumulation matmuls.
    pv = jnp.concatenate(pv_heads, axis=-1).astype(jnp.bfloat16)      # (M, C)
    out = jnp.dot(pv, wproj_ref[...],
                  preferred_element_type=jnp.float32) + bproj_ref[0]
    o_ref[...] = out.astype(o_ref.dtype)


def _choose_block_windows(B_, nW, N, target_rows=4096):
    """Windows per grid step: a multiple of nW dividing B_, targeting a few
    thousand flattened token rows, preferring an even step count >= 2 so the
    'parallel' grid axis splits across both TensorCores on v7x."""
    B = B_ // nW
    divs = [d for d in range(1, B + 1) if B % d == 0]
    fit = [d for d in divs if d * nW * N <= target_rows] or [1]
    even = [d for d in fit if (B // d) >= 2 and (B // d) % 2 == 0]
    multi = [d for d in fit if B // d >= 2]
    pool = even or multi or fit
    return max(pool) * nW


def window_attention_3d(x, wqkv_t, bqkv, wproj_t, bproj, rel_bias, num_heads,
                        mask=None, block_windows=None):
    """Pallas wrapper.

    x:        (B_, N, C)   with B_ = batch * nW, windows innermost
    wqkv_t:   (C, 3C)      (= torch qkv.weight.T)
    bqkv:     (3C,)
    wproj_t:  (C, C)       (= torch proj.weight.T)
    bproj:    (C,)
    rel_bias: (H, N, N)    relative position bias gathered from the table
    mask:     (nW, N, N)   additive mask or None
    """
    B_, N, C = x.shape
    hd = C // num_heads
    scale = hd ** (-0.5)

    nW = 1 if mask is None else mask.shape[0]
    if B_ % nW != 0:
        raise ValueError("B_ must be a multiple of the number of mask windows")

    # Pre-combine rel-pos bias and the additive mask into (nW, H, N, N).
    bias = jnp.asarray(rel_bias, jnp.float32)[None]
    if mask is not None:
        bias = bias + jnp.asarray(mask, jnp.float32)[:, None]

    # Pre-scale the q slice of the fused QKV weight / bias by head_dim**-0.5;
    # weights go in as bf16 MXU operands, biases stay f32.
    wqkv_t = jnp.asarray(wqkv_t, jnp.float32)
    bqkv = jnp.asarray(bqkv, jnp.float32)
    wqkv_s = jnp.concatenate([wqkv_t[:, :C] * scale, wqkv_t[:, C:]],
                             axis=1).astype(jnp.bfloat16)
    bqkv_s = jnp.concatenate([bqkv[:C] * scale, bqkv[C:]]).reshape(1, 3 * C)
    wproj_b = jnp.asarray(wproj_t, jnp.float32).astype(jnp.bfloat16)
    bproj_2d = jnp.asarray(bproj, jnp.float32).reshape(1, C)

    if block_windows is None:
        block_windows = _choose_block_windows(B_, nW, N)
    if B_ % block_windows != 0 or block_windows % nW != 0:
        raise ValueError("block_windows must divide B_ and be a multiple of nW")
    rows = block_windows * N
    grid = (B_ // block_windows,)

    # Flat (B_*N, C) view of x / out (free reshape in HBM).
    x2 = x.reshape(B_ * N, C)

    kernel = functools.partial(_window_attn_kernel, num_heads=num_heads,
                               nW=nW, tokens=N)

    out = pl.pallas_call(
        kernel,
        out_shape=jax.ShapeDtypeStruct((B_ * N, C), x.dtype),
        grid_spec=pltpu.PrefetchScalarGridSpec(
            num_scalar_prefetch=0,
            grid=grid,
            in_specs=[
                pl.BlockSpec((rows, C), lambda g: (g, 0)),                    # x
                pl.BlockSpec((C, 3 * C), lambda g: (0, 0)),                   # wqkv (bf16)
                pl.BlockSpec((1, 3 * C), lambda g: (0, 0)),                   # bqkv
                pl.BlockSpec((nW, num_heads, N, N), lambda g: (0, 0, 0, 0)),  # bias
                pl.BlockSpec((C, C), lambda g: (0, 0)),                       # wproj (bf16)
                pl.BlockSpec((1, C), lambda g: (0, 0)),                       # bproj
            ],
            out_specs=pl.BlockSpec((rows, C), lambda g: (g, 0)),
        ),
        compiler_params=pltpu.CompilerParams(
            dimension_semantics=("parallel",),
            vmem_limit_bytes=48 * 1024 * 1024),
    )(x2, wqkv_s, bqkv_s, bias, wproj_b, bproj_2d)

    return out.reshape(B_, N, C)


def make_relative_position_index(window_size):
    Wd, Wh, Ww = window_size
    coords = jnp.stack(jnp.meshgrid(jnp.arange(Wd), jnp.arange(Wh), jnp.arange(Ww),
                                    indexing="ij"))                      # (3, Wd, Wh, Ww)
    coords_flatten = coords.reshape(3, -1)                               # (3, N)
    rel = coords_flatten[:, :, None] - coords_flatten[:, None, :]        # (3, N, N)
    rel = rel.transpose(1, 2, 0)                                         # (N, N, 3)
    rel = rel + jnp.array([Wd - 1, Wh - 1, Ww - 1])
    rel = rel * jnp.array([(2 * Wh - 1) * (2 * Ww - 1), (2 * Ww - 1), 1])
    return rel.sum(-1)                                                   # (N, N)


def reference(x, wqkv_t, bqkv, wproj_t, bproj, rel_bias, num_heads, mask=None):
    # Pure-JAX reference mirroring the PyTorch forward.
    P = jax.lax.Precision.HIGHEST
    B_, N, C = x.shape
    hd = C // num_heads
    scale = hd ** (-0.5)
    qkv = jnp.einsum("bnc,cd->bnd", x, wqkv_t, precision=P) + bqkv
    qkv = qkv.reshape(B_, N, 3, num_heads, hd).transpose(2, 0, 3, 1, 4)
    q, k, v = qkv[0] * scale, qkv[1], qkv[2]
    attn = jnp.einsum("bhnd,bhmd->bhnm", q, k, precision=P) + rel_bias[None]
    if mask is not None:
        nW = mask.shape[0]
        attn = attn.reshape(B_ // nW, nW, num_heads, N, N) + mask[None, :, None]
        attn = attn.reshape(B_, num_heads, N, N)
    attn = jax.nn.softmax(attn, axis=-1)
    out = jnp.einsum("bhnm,bhmd->bhnd", attn, v, precision=P)
    out = out.transpose(0, 2, 1, 3).reshape(B_, N, C)
    return jnp.einsum("bnc,cd->bnd", out, wproj_t, precision=P) + bproj


if __name__ == "__main__":
    key = jax.random.PRNGKey(0)
    dim = 32
    num_heads = 4
    window_size = (2, 4, 4)
    N = window_size[0] * window_size[1] * window_size[2]   # 32 tokens per window
    nW = 3                                                  # windows per image
    B = 2
    B_ = B * nW                                             # 6

    keys = jax.random.split(key, 7)
    x = jax.random.normal(keys[0], (B_, N, dim), jnp.float32)

    # Deterministic "trunc_normal_" style parameter init (synthetic weights).
    table_size = ((2 * window_size[0] - 1) * (2 * window_size[1] - 1) *
                  (2 * window_size[2] - 1))
    rel_table = 0.02 * jax.random.truncated_normal(
        keys[1], -2.0, 2.0, (table_size, num_heads), jnp.float32)
    wqkv_t = 0.02 * jax.random.normal(keys[2], (dim, 3 * dim), jnp.float32)   # qkv.weight.T
    bqkv = 0.01 * jax.random.normal(keys[3], (3 * dim,), jnp.float32)
    wproj_t = 0.02 * jax.random.normal(keys[4], (dim, dim), jnp.float32)      # proj.weight.T
    bproj = 0.01 * jax.random.normal(keys[5], (dim,), jnp.float32)

    # Gather relative position bias (glue, plain JAX) -> (H, N, N)
    rel_index = make_relative_position_index(window_size)                     # (N, N)
    rel_bias = rel_table[rel_index.reshape(-1)].reshape(N, N, num_heads)
    rel_bias = rel_bias.transpose(2, 0, 1)

    # Additive attention mask (0 / -100) per window, as in shifted-window attention.
    mask = jnp.where(
        jax.random.uniform(keys[6], (nW, N, N)) > 0.5, 0.0, -100.0
    ).astype(jnp.float32)

    # No-mask run
    out_nomask = window_attention_3d(x, wqkv_t, bqkv, wproj_t, bproj,
                                     rel_bias, num_heads, mask=None)
    out_nomask = jax.block_until_ready(out_nomask)
    ref_nomask = reference(x, wqkv_t, bqkv, wproj_t, bproj, rel_bias, num_heads, mask=None)

    # Masked run
    out_masked = window_attention_3d(x, wqkv_t, bqkv, wproj_t, bproj,
                                     rel_bias, num_heads, mask=mask)
    out_masked = jax.block_until_ready(out_masked)
    ref_masked = reference(x, wqkv_t, bqkv, wproj_t, bproj, rel_bias, num_heads, mask=mask)

    assert out_nomask.shape == (B_, N, dim)
    assert jnp.allclose(out_nomask, ref_nomask, atol=2e-3, rtol=1e-2)
    assert jnp.allclose(out_masked, ref_masked, atol=2e-3, rtol=1e-2)

    print("KERNEL_OK")
</pallas_src>

<mosaic_0001>
module attributes {stable_mosaic.version = 11 : i64} {
  func.func @_window_attn_kernel(%arg0: i32, %arg1: memref<96x32xf32, #tpu.memory_space<vmem>>, %arg2: memref<32x96xbf16, #tpu.memory_space<vmem>>, %arg3: memref<1x96xf32, #tpu.memory_space<vmem>>, %arg4: memref<1x4x32x32xf32, #tpu.memory_space<vmem>>, %arg5: memref<32x32xbf16, #tpu.memory_space<vmem>>, %arg6: memref<1x32xf32, #tpu.memory_space<vmem>>, %arg7: memref<96x32xf32, #tpu.memory_space<vmem>>) attributes {dimension_semantics = [#tpu.dimension_semantics<parallel>], iteration_bounds = array<i64: 2>, scalar_prefetch = 0 : i64, scratch_operands = 0 : i64, tpu.core_type = #tpu.core_type<tc>, window_params = [{transform_indices = @transform_0, window_bounds = array<i64: 96, 32>}, {pipeline_mode = #tpu.pipeline_mode<synchronous>, transform_indices = @transform_1, window_bounds = array<i64: 32, 96>}, {pipeline_mode = #tpu.pipeline_mode<synchronous>, transform_indices = @transform_2, window_bounds = array<i64: 1, 96>}, {pipeline_mode = #tpu.pipeline_mode<synchronous>, transform_indices = @transform_3, window_bounds = array<i64: 1, 4, 32, 32>}, {pipeline_mode = #tpu.pipeline_mode<synchronous>, transform_indices = @transform_4, window_bounds = array<i64: 32, 32>}, {pipeline_mode = #tpu.pipeline_mode<synchronous>, transform_indices = @transform_5, window_bounds = array<i64: 1, 32>}, {transform_indices = @transform_6, window_bounds = array<i64: 96, 32>}]} {
    %c0 = arith.constant 0 : index
    %c0_0 = arith.constant 0 : index
    %0 = vector.load %arg1[%c0, %c0_0] : memref<96x32xf32, #tpu.memory_space<vmem>>, vector<96x32xf32>
    %1 = arith.truncf %0 : vector<96x32xf32> to vector<96x32xbf16>
    %c0_1 = arith.constant 0 : index
    %c0_2 = arith.constant 0 : index
    %2 = vector.load %arg2[%c0_1, %c0_2] : memref<32x96xbf16, #tpu.memory_space<vmem>>, vector<32x96xbf16>
    %cst = arith.constant dense<0.000000e+00> : vector<96x96xf32>
    %3 = tpu.matmul %1, %2, %cst {dimension_numbers = #tpu.dot_dimension_numbers<[1], [0], [0], [1], [0, 0, 1, 1], [], []>} : vector<96x32xbf16>, vector<32x96xbf16>, vector<96x96xf32> -> vector<96x96xf32>
    %c0_3 = arith.constant 0 : index
    %c0_4 = arith.constant 0 : index
    %4 = vector.load %arg3[%c0_3, %c0_4] : memref<1x96xf32, #tpu.memory_space<vmem>>, vector<1x96xf32>
    %5 = vector.shape_cast %4 : vector<1x96xf32> to vector<96xf32>
    %6 = vector.shape_cast %5 : vector<96xf32> to vector<1x96xf32>
    %7 = vector.broadcast %6 : vector<1x96xf32> to vector<96x96xf32>
    %8 = arith.addf %3, %7 : vector<96x96xf32>
    %9 = arith.truncf %8 : vector<96x96xf32> to vector<96x96xbf16>
    %c0_5 = arith.constant 0 : index
    %c0_6 = arith.constant 0 : index
    %c0_7 = arith.constant 0 : index
    %c0_8 = arith.constant 0 : index
    %10 = vector.load %arg4[%c0_5, %c0_6, %c0_7, %c0_8] : memref<1x4x32x32xf32, #tpu.memory_space<vmem>>, vector<1x4x32x32xf32>
    %11 = vector.extract_strided_slice %9 {offsets = [0, 0], sizes = [96, 8], strides = [1, 1]} : vector<96x96xbf16> to vector<96x8xbf16>
    %12 = vector.shape_cast %11 : vector<96x8xbf16> to vector<3x32x8xbf16>
    %13 = vector.extract_strided_slice %9 {offsets = [0, 32], sizes = [96, 8], strides = [1, 1]} : vector<96x96xbf16> to vector<96x8xbf16>
    %14 = vector.shape_cast %13 : vector<96x8xbf16> to vector<3x32x8xbf16>
    %15 = vector.extract_strided_slice %9 {offsets = [0, 64], sizes = [96, 8], strides = [1, 1]} : vector<96x96xbf16> to vector<96x8xbf16>
    %16 = vector.shape_cast %15 : vector<96x8xbf16> to vector<3x32x8xbf16>
    "tpu.trace_start"() <{level = 10 : i32, message = "bnd,bmd->bnm"}> : () -> ()
    %cst_9 = arith.constant dense<0.000000e+00> : vector<3x32x32xf32>
    %17 = tpu.matmul %12, %14, %cst_9 {dimension_numbers = #tpu.dot_dimension_numbers<[2], [2], [1], [1], [0, 0, 0, 1, 1, 1], [0], [0]>} : vector<3x32x8xbf16>, vector<3x32x8xbf16>, vector<3x32x32xf32> -> vector<3x32x32xf32>
    "tpu.trace_stop"() : () -> ()
    %18 = vector.shape_cast %17 : vector<3x32x32xf32> to vector<3x1x32x32xf32>
    %19 = vector.extract_strided_slice %10 {offsets = [0, 0, 0, 0], sizes = [1, 1, 32, 32], strides = [1, 1, 1, 1]} : vector<1x4x32x32xf32> to vector<1x1x32x32xf32>
    %20 = vector.shape_cast %19 : vector<1x1x32x32xf32> to vector<1x32x32xf32>
    %21 = vector.shape_cast %20 : vector<1x32x32xf32> to vector<1x1x32x32xf32>
    %22 = vector.broadcast %21 : vector<1x1x32x32xf32> to vector<3x1x32x32xf32>
    %23 = arith.addf %18, %22 : vector<3x1x32x32xf32>
    %24 = vector.shape_cast %23 : vector<3x1x32x32xf32> to vector<3x32x32xf32>
    %cst_10 = arith.constant dense<0xFF800000> : vector<3x32xf32>
    %25 = vector.multi_reduction <maximumf>, %24, %cst_10 [2] : vector<3x32x32xf32> to vector<3x32xf32>
    %26 = vector.shape_cast %25 : vector<3x32xf32> to vector<3x32x1xf32>
    %27 = vector.broadcast %26 : vector<3x32x1xf32> to vector<3x32x32xf32>
    %28 = arith.subf %24, %27 : vector<3x32x32xf32>
    %29 = math.exp %28 : vector<3x32x32xf32>
    %cst_11 = arith.constant dense<0.000000e+00> : vector<3x32xf32>
    %30 = vector.multi_reduction <add>, %29, %cst_11 [2] : vector<3x32x32xf32> to vector<3x32xf32>
    %31 = vector.shape_cast %30 : vector<3x32xf32> to vector<3x32x1xf32>
    %32 = tpu.reciprocal %31 {approx = true} : vector<3x32x1xf32> -> vector<3x32x1xf32>
    %33 = vector.broadcast %32 : vector<3x32x1xf32> to vector<3x32x32xf32>
    %34 = arith.mulf %29, %33 : vector<3x32x32xf32>
    %35 = arith.truncf %34 : vector<3x32x32xf32> to vector<3x32x32xbf16>
    "tpu.trace_start"() <{level = 10 : i32, message = "bnm,bmd->bnd"}> : () -> ()
    %cst_12 = arith.constant dense<0.000000e+00> : vector<3x32x8xf32>
    %36 = tpu.matmul %35, %16, %cst_12 {dimension_numbers = #tpu.dot_dimension_numbers<[2], [1], [1], [2], [0, 0, 0, 1, 1, 2], [0], [0]>} : vector<3x32x32xbf16>, vector<3x32x8xbf16>, vector<3x32x8xf32> -> vector<3x32x8xf32>
    "tpu.trace_stop"() : () -> ()
    %37 = vector.shape_cast %36 : vector<3x32x8xf32> to vector<96x8xf32>
    %38 = vector.extract_strided_slice %9 {offsets = [0, 8], sizes = [96, 8], strides = [1, 1]} : vector<96x96xbf16> to vector<96x8xbf16>
    %39 = vector.shape_cast %38 : vector<96x8xbf16> to vector<3x32x8xbf16>
    %40 = vector.extract_strided_slice %9 {offsets = [0, 40], sizes = [96, 8], strides = [1, 1]} : vector<96x96xbf16> to vector<96x8xbf16>
    %41 = vector.shape_cast %40 : vector<96x8xbf16> to vector<3x32x8xbf16>
    %42 = vector.extract_strided_slice %9 {offsets = [0, 72], sizes = [96, 8], strides = [1, 1]} : vector<96x96xbf16> to vector<96x8xbf16>
    %43 = vector.shape_cast %42 : vector<96x8xbf16> to vector<3x32x8xbf16>
    "tpu.trace_start"() <{level = 10 : i32, message = "bnd,bmd->bnm"}> : () -> ()
    %cst_13 = arith.constant dense<0.000000e+00> : vector<3x32x32xf32>
    %44 = tpu.matmul %39, %41, %cst_13 {dimension_numbers = #tpu.dot_dimension_numbers<[2], [2], [1], [1], [0, 0, 0, 1, 1, 1], [0], [0]>} : vector<3x32x8xbf16>, vector<3x32x8xbf16>, vector<3x32x32xf32> -> vector<3x32x32xf32>
    "tpu.trace_stop"() : () -> ()
    %45 = vector.shape_cast %44 : vector<3x32x32xf32> to vector<3x1x32x32xf32>
    %46 = vector.extract_strided_slice %10 {offsets = [0, 1, 0, 0], sizes = [1, 1, 32, 32], strides = [1, 1, 1, 1]} : vector<1x4x32x32xf32> to vector<1x1x32x32xf32>
    %47 = vector.shape_cast %46 : vector<1x1x32x32xf32> to vector<1x32x32xf32>
    %48 = vector.shape_cast %47 : vector<1x32x32xf32> to vector<1x1x32x32xf32>
    %49 = vector.broadcast %48 : vector<1x1x32x32xf32> to vector<3x1x32x32xf32>
    %50 = arith.addf %45, %49 : vector<3x1x32x32xf32>
    %51 = vector.shape_cast %50 : vector<3x1x32x32xf32> to vector<3x32x32xf32>
    %cst_14 = arith.constant dense<0xFF800000> : vector<3x32xf32>
    %52 = vector.multi_reduction <maximumf>, %51, %cst_14 [2] : vector<3x32x32xf32> to vector<3x32xf32>
    %53 = vector.shape_cast %52 : vector<3x32xf32> to vector<3x32x1xf32>
    %54 = vector.broadcast %53 : vector<3x32x1xf32> to vector<3x32x32xf32>
    %55 = arith.subf %51, %54 : vector<3x32x32xf32>
    %56 = math.exp %55 : vector<3x32x32xf32>
    %cst_15 = arith.constant dense<0.000000e+00> : vector<3x32xf32>
    %57 = vector.multi_reduction <add>, %56, %cst_15 [2] : vector<3x32x32xf32> to vector<3x32xf32>
    %58 = vector.shape_cast %57 : vector<3x32xf32> to vector<3x32x1xf32>
    %59 = tpu.reciprocal %58 {approx = true} : vector<3x32x1xf32> -> vector<3x32x1xf32>
    %60 = vector.broadcast %59 : vector<3x32x1xf32> to vector<3x32x32xf32>
    %61 = arith.mulf %56, %60 : vector<3x32x32xf32>
    %62 = arith.truncf %61 : vector<3x32x32xf32> to vector<3x32x32xbf16>
    "tpu.trace_start"() <{level = 10 : i32, message = "bnm,bmd->bnd"}> : () -> ()
    %cst_16 = arith.constant dense<0.000000e+00> : vector<3x32x8xf32>
    %63 = tpu.matmul %62, %43, %cst_16 {dimension_numbers = #tpu.dot_dimension_numbers<[2], [1], [1], [2], [0, 0, 0, 1, 1, 2], [0], [0]>} : vector<3x32x32xbf16>, vector<3x32x8xbf16>, vector<3x32x8xf32> -> vector<3x32x8xf32>
    "tpu.trace_stop"() : () -> ()
    %64 = vector.shape_cast %63 : vector<3x32x8xf32> to vector<96x8xf32>
    %65 = vector.extract_strided_slice %9 {offsets = [0, 16], sizes = [96, 8], strides = [1, 1]} : vector<96x96xbf16> to vector<96x8xbf16>
    %66 = vector.shape_cast %65 : vector<96x8xbf16> to vector<3x32x8xbf16>
    %67 = vector.extract_strided_slice %9 {offsets = [0, 48], sizes = [96, 8], strides = [1, 1]} : vector<96x96xbf16> to vector<96x8xbf16>
    %68 = vector.shape_cast %67 : vector<96x8xbf16> to vector<3x32x8xbf16>
    %69 = vector.extract_strided_slice %9 {offsets = [0, 80], sizes = [96, 8], strides = [1, 1]} : vector<96x96xbf16> to vector<96x8xbf16>
    %70 = vector.shape_cast %69 : vector<96x8xbf16> to vector<3x32x8xbf16>
    "tpu.trace_start"() <{level = 10 : i32, message = "bnd,bmd->bnm"}> : () -> ()
    %cst_17 = arith.constant dense<0.000000e+00> : vector<3x32x32xf32>
    %71 = tpu.matmul %66, %68, %cst_17 {dimension_numbers = #tpu.dot_dimension_numbers<[2], [2], [1], [1], [0, 0, 0, 1, 1, 1], [0], [0]>} : vector<3x32x8xbf16>, vector<3x32x8xbf16>, vector<3x32x32xf32> -> vector<3x32x32xf32>
    "tpu.trace_stop"() : () -> ()
    %72 = vector.shape_cast %71 : vector<3x32x32xf32> to vector<3x1x32x32xf32>
    %73 = vector.extract_strided_slice %10 {offsets = [0, 2, 0, 0], sizes = [1, 1, 32, 32], strides = [1, 1, 1, 1]} : vector<1x4x32x32xf32> to vector<1x1x32x32xf32>
    %74 = vector.shape_cast %73 : vector<1x1x32x32xf32> to vector<1x32x32xf32>
    %75 = vector.shape_cast %74 : vector<1x32x32xf32> to vector<1x1x32x32xf32>
    %76 = vector.broadcast %75 : vector<1x1x32x32xf32> to vector<3x1x32x32xf32>
    %77 = arith.addf %72, %76 : vector<3x1x32x32xf32>
    %78 = vector.shape_cast %77 : vector<3x1x32x32xf32> to vector<3x32x32xf32>
    %cst_18 = arith.constant dense<0xFF800000> : vector<3x32xf32>
    %79 = vector.multi_reduction <maximumf>, %78, %cst_18 [2] : vector<3x32x32xf32> to vector<3x32xf32>
    %80 = vector.shape_cast %79 : vector<3x32xf32> to vector<3x32x1xf32>
    %81 = vector.broadcast %80 : vector<3x32x1xf32> to vector<3x32x32xf32>
    %82 = arith.subf %78, %81 : vector<3x32x32xf32>
    %83 = math.exp %82 : vector<3x32x32xf32>
    %cst_19 = arith.constant dense<0.000000e+00> : vector<3x32xf32>
    %84 = vector.multi_reduction <add>, %83, %cst_19 [2] : vector<3x32x32xf32> to vector<3x32xf32>
    %85 = vector.shape_cast %84 : vector<3x32xf32> to vector<3x32x1xf32>
    %86 = tpu.reciprocal %85 {approx = true} : vector<3x32x1xf32> -> vector<3x32x1xf32>
    %87 = vector.broadcast %86 : vector<3x32x1xf32> to vector<3x32x32xf32>
    %88 = arith.mulf %83, %87 : vector<3x32x32xf32>
    %89 = arith.truncf %88 : vector<3x32x32xf32> to vector<3x32x32xbf16>
    "tpu.trace_start"() <{level = 10 : i32, message = "bnm,bmd->bnd"}> : () -> ()
    %cst_20 = arith.constant dense<0.000000e+00> : vector<3x32x8xf32>
    %90 = tpu.matmul %89, %70, %cst_20 {dimension_numbers = #tpu.dot_dimension_numbers<[2], [1], [1], [2], [0, 0, 0, 1, 1, 2], [0], [0]>} : vector<3x32x32xbf16>, vector<3x32x8xbf16>, vector<3x32x8xf32> -> vector<3x32x8xf32>
    "tpu.trace_stop"() : () -> ()
    %91 = vector.shape_cast %90 : vector<3x32x8xf32> to vector<96x8xf32>
    %92 = vector.extract_strided_slice %9 {offsets = [0, 24], sizes = [96, 8], strides = [1, 1]} : vector<96x96xbf16> to vector<96x8xbf16>
    %93 = vector.shape_cast %92 : vector<96x8xbf16> to vector<3x32x8xbf16>
    %94 = vector.extract_strided_slice %9 {offsets = [0, 56], sizes = [96, 8], strides = [1, 1]} : vector<96x96xbf16> to vector<96x8xbf16>
    %95 = vector.shape_cast %94 : vector<96x8xbf16> to vector<3x32x8xbf16>
    %96 = vector.extract_strided_slice %9 {offsets = [0, 88], sizes = [96, 8], strides = [1, 1]} : vector<96x96xbf16> to vector<96x8xbf16>
    %97 = vector.shape_cast %96 : vector<96x8xbf16> to vector<3x32x8xbf16>
    "tpu.trace_start"() <{level = 10 : i32, message = "bnd,bmd->bnm"}> : () -> ()
    %cst_21 = arith.constant dense<0.000000e+00> : vector<3x32x32xf32>
    %98 = tpu.matmul %93, %95, %cst_21 {dimension_numbers = #tpu.dot_dimension_numbers<[2], [2], [1], [1], [0, 0, 0, 1, 1, 1], [0], [0]>} : vector<3x32x8xbf16>, vector<3x32x8xbf16>, vector<3x32x32xf32> -> vector<3x32x32xf32>
    "tpu.trace_stop"() : () -> ()
    %99 = vector.shape_cast %98 : vector<3x32x32xf32> to vector<3x1x32x32xf32>
    %100 = vector.extract_strided_slice %10 {offsets = [0, 3, 0, 0], sizes = [1, 1, 32, 32], strides = [1, 1, 1, 1]} : vector<1x4x32x32xf32> to vector<1x1x32x32xf32>
    %101 = vector.shape_cast %100 : vector<1x1x32x32xf32> to vector<1x32x32xf32>
    %102 = vector.shape_cast %101 : vector<1x32x32xf32> to vector<1x1x32x32xf32>
    %103 = vector.broadcast %102 : vector<1x1x32x32xf32> to vector<3x1x32x32xf32>
    %104 = arith.addf %99, %103 : vector<3x1x32x32xf32>
    %105 = vector.shape_cast %104 : vector<3x1x32x32xf32> to vector<3x32x32xf32>
    %cst_22 = arith.constant dense<0xFF800000> : vector<3x32xf32>
    %106 = vector.multi_reduction <maximumf>, %105, %cst_22 [2] : vector<3x32x32xf32> to vector<3x32xf32>
    %107 = vector.shape_cast %106 : vector<3x32xf32> to vector<3x32x1xf32>
    %108 = vector.broadcast %107 : vector<3x32x1xf32> to vector<3x32x32xf32>
    %109 = arith.subf %105, %108 : vector<3x32x32xf32>
    %110 = math.exp %109 : vector<3x32x32xf32>
    %cst_23 = arith.constant dense<0.000000e+00> : vector<3x32xf32>
    %111 = vector.multi_reduction <add>, %110, %cst_23 [2] : vector<3x32x32xf32> to vector<3x32xf32>
    %112 = vector.shape_cast %111 : vector<3x32xf32> to vector<3x32x1xf32>
    %113 = tpu.reciprocal %112 {approx = true} : vector<3x32x1xf32> -> vector<3x32x1xf32>
    %114 = vector.broadcast %113 : vector<3x32x1xf32> to vector<3x32x32xf32>
    %115 = arith.mulf %110, %114 : vector<3x32x32xf32>
    %116 = arith.truncf %115 : vector<3x32x32xf32> to vector<3x32x32xbf16>
    "tpu.trace_start"() <{level = 10 : i32, message = "bnm,bmd->bnd"}> : () -> ()
    %cst_24 = arith.constant dense<0.000000e+00> : vector<3x32x8xf32>
    %117 = tpu.matmul %116, %97, %cst_24 {dimension_numbers = #tpu.dot_dimension_numbers<[2], [1], [1], [2], [0, 0, 0, 1, 1, 2], [0], [0]>} : vector<3x32x32xbf16>, vector<3x32x8xbf16>, vector<3x32x8xf32> -> vector<3x32x8xf32>
    "tpu.trace_stop"() : () -> ()
    %118 = vector.shape_cast %117 : vector<3x32x8xf32> to vector<96x8xf32>
    %119 = tpu.concatenate %37, %64, %91, %118 in 1 : vector<96x8xf32>, vector<96x8xf32>, vector<96x8xf32>, vector<96x8xf32> -> vector<96x32xf32>
    %120 = arith.truncf %119 : vector<96x32xf32> to vector<96x32xbf16>
    %c0_25 = arith.constant 0 : index
    %c0_26 = arith.constant 0 : index
    %121 = vector.load %arg5[%c0_25, %c0_26] : memref<32x32xbf16, #tpu.memory_space<vmem>>, vector<32x32xbf16>
    %cst_27 = arith.constant dense<0.000000e+00> : vector<96x32xf32>
    %122 = tpu.matmul %120, %121, %cst_27 {dimension_numbers = #tpu.dot_dimension_numbers<[1], [0], [0], [1], [0, 0, 1, 1], [], []>} : vector<96x32xbf16>, vector<32x32xbf16>, vector<96x32xf32> -> vector<96x32xf32>
    %c0_28 = arith.constant 0 : index
    %c0_29 = arith.constant 0 : index
    %123 = vector.load %arg6[%c0_28, %c0_29] : memref<1x32xf32, #tpu.memory_space<vmem>>, vector<1x32xf32>
    %124 = vector.shape_cast %123 : vector<1x32xf32> to vector<32xf32>
    %125 = vector.shape_cast %124 : vector<32xf32> to vector<1x32xf32>
    %126 = vector.broadcast %125 : vector<1x32xf32> to vector<96x32xf32>
    %127 = arith.addf %122, %126 : vector<96x32xf32>
    %c0_30 = arith.constant 0 : index
    %c0_31 = arith.constant 0 : index
    %128 = vector.load %arg7[%c0_30, %c0_31] : memref<96x32xf32, #tpu.memory_space<vmem>>, vector<96x32xf32>
    tpu.vector_store %arg7[%c0_30, %c0_31], %127 {strides = array<i32>} : memref<96x32xf32, #tpu.memory_space<vmem>>, vector<96x32xf32>,
    return
  }
  func.func @transform_0(%arg0: i32) -> (i32, i32) {
    %c0_i32 = arith.constant 0 : i32
    %c0_i32_0 = arith.constant 0 : i32
    return %arg0, %c0_i32 : i32, i32
  }
  func.func @transform_1(%arg0: i32) -> (i32, i32) {
    %c0_i32 = arith.constant 0 : i32
    %c0_i32_0 = arith.constant 0 : i32
    %c0_i32_1 = arith.constant 0 : i32
    return %c0_i32, %c0_i32_0 : i32, i32
  }
  func.func @transform_2(%arg0: i32) -> (i32, i32) {
    %c0_i32 = arith.constant 0 : i32
    %c0_i32_0 = arith.constant 0 : i32
    %c0_i32_1 = arith.constant 0 : i32
    return %c0_i32, %c0_i32_0 : i32, i32
  }
  func.func @transform_3(%arg0: i32) -> (i32, i32, i32, i32) {
    %c0_i32 = arith.constant 0 : i32
    %c0_i32_0 = arith.constant 0 : i32
    %c0_i32_1 = arith.constant 0 : i32
    %c0_i32_2 = arith.constant 0 : i32
    %c0_i32_3 = arith.constant 0 : i32
    return %c0_i32, %c0_i32_0, %c0_i32_1, %c0_i32_2 : i32, i32, i32, i32
  }
  func.func @transform_4(%arg0: i32) -> (i32, i32) {
    %c0_i32 = arith.constant 0 : i32
    %c0_i32_0 = arith.constant 0 : i32
    %c0_i32_1 = arith.constant 0 : i32
    return %c0_i32, %c0_i32_0 : i32, i32
  }
  func.func @transform_5(%arg0: i32) -> (i32, i32) {
    %c0_i32 = arith.constant 0 : i32
    %c0_i32_0 = arith.constant 0 : i32
    %c0_i32_1 = arith.constant 0 : i32
    return %c0_i32, %c0_i32_0 : i32, i32
  }
  func.func @transform_6(%arg0: i32) -> (i32, i32) {
    %c0_i32 = arith.constant 0 : i32
    %c0_i32_0 = arith.constant 0 : i32
    return %arg0, %c0_i32 : i32, i32
  }
}

</mosaic_0001>

<bundles_post_ra>
// kernel: tpu_custom_call.1
= control target key start
LH: loop header
LB: loop body
LE: loop exit
PB: predicated region body
PF: predicated region fallthrough
CT: control target
= control target key end

     0   :  { %s3752_s21 = smov 0   ;;  %s4708_s0 = inlined_call_operand.vmem [shape: f32[192,32], index: 0, kind: input, shape index: {}]   ;;  %s4709_s1 = inlined_call_operand.vmem [shape: bf16[32,96], index: 1, kind: input, shape index: {}]   ;;  %s4710_s2 = inlined_call_operand.vmem [shape: f32[1,96], index: 2, kind: input, shape index: {}]   ;;  %s4711_s3 = inlined_call_operand.vmem [shape: f32[1,4,32,32], index: 3, kind: input, shape index: {}]   ;;  %s4712_s4 = inlined_call_operand.vmem [shape: bf16[32,32], index: 4, kind: input, shape index: {}]   ;;  %s4713_s5 = inlined_call_operand.vmem [shape: f32[1,32], index: 5, kind: input, shape index: {}]   ;;  %s4714_s6 = inlined_call_operand.vmem [shape: f32[192,32], index: 6, kind: output, shape index: {}]  }
   0x1 LB: > { %s2952_s22 = sadd.s32 4294967295, %s3701_s21   ;;  %p2956_p0 = scmp.ge.s32.totalorder %s3701_s21, 1  ;;  %s3701_s21 = sphi %s3752_s21, %s16_s21  }
   0x2   : > { %p213_p1 = scmp.lt.s32.totalorder %s3701_s21, 3 }
   0x4   : > { %p214_p2 = pnand %p2956_p0, %p213_p1 }
   0x6   : > { %217 = sbr.rel (%p214_p2) target bundleno = 3065 (0xbf9), region = 44 }
   0xb   : > { %v3499_v0 = vld [vmem:[%s4709_s1 + $0x8] sm:$0xff]   ;;  %s243_s25 = smul.u32 12, %s2952_s22  ;;  %v3500_v1 = vld [vmem:[%s4709_s1] sm:$0xff]   ;;  %vm297_vm0 = vcmask 261120   ;;  %vm425_vm1 = vcmask 64512   ;;  %s3703_s10 = smov 96  }
   0xc   : > { %3139 = vmatprep.subr.bf16.mxu1 %v3499_v0  ;;  %v2959_v21 = vld [vmem:[%s4710_s2] ss:$0 sm:$0xff]  ;;  %v405_v63 = vld [vmem:[%s4711_s3 + $0x10] sm:$0xff]  ;;  %s3704_s19 = smov 64   ;;  %s3705_s20 = smov 88   ;;  %vm2730_vm2 = vcmask 130048  }
   0xd   : > { %p244_p3 = scmp.lt.s32.totalorder %s243_s25, 23  ;;  %3140 = vmatpush3.bf16.msra.mxu1 %v3499_v0  ;;  %s3706_s22 = smov 120   ;;  %vm2743_vm3 = vcmask 195584  }
   0xe   : > { %3141 = vmatprep.subr.bf16.mxu1 %v3500_v1  ;;  %s3707_s9 = smov 56   ;;  %s3709_s11 = smov 112  }
   0xf   : > { %s4734_s25 = smov (!%p244_p3, %s243_s25), 23  ;;  %s3712_s23 = smov 104  }
  0x10   : > { %s2957_s28 = sshll.u32 %s4734_s25, 3  ;;  %s3715_s12 = smov 16  }
  0x11   : > { %3142 = vmatpush3.bf16.msra.mxu1 %v3500_v1  ;;  %s247_s7 = scalar_lea.vmem %s4708_s0, %s2957_s28  ;;  %v403_v1 = vld [vmem:[%s4711_s3] sm:$0xff]  ;;  %s3716_s17 = smov 24  }
  0x12   : > { %v256_v2 = vld [vmem:[%s247_s7] sm:$0xff]  ;;  %v257_v3 = vld [vmem:[%s247_s7 + $0x8] sm:$0xff]  ;;  %v258_v4 = vld [vmem:[%s247_s7 + $0x10] sm:$0xff] }
  0x13   : > { %v268_v5 = vpack.c.bf16 %v257_v3, %v256_v2  ;;  %v259_v6 = vld [vmem:[%s247_s7 + $0x18] sm:$0xff]  ;;  %v260_v7 = vld [vmem:[%s247_s7 + $0x20] sm:$0xff]  ;;  %v261_v8 = vld [vmem:[%s247_s7 + $0x28] sm:$0xff] }
  0x14   : > { %v269_v9 = vpack.c.bf16 %v259_v6, %v258_v4  ;;  %v270_v10 = vpack.c.bf16 %v261_v8, %v260_v7  ;;  %v262_v11 = vld [vmem:[%s247_s7 + $0x30] sm:$0xff]  ;;  %v263_v12 = vld [vmem:[%s247_s7 + $0x38] sm:$0xff]  ;;  %v264_v13 = vld [vmem:[%s247_s7 + $0x40] sm:$0xff] }
  0x15   : > { %3143 = vmatprep.mubr.msk.bf16.mxu1 %vm297_vm0, %v268_v5  ;;  %v265_v14 = vld [vmem:[%s247_s7 + $0x48] sm:$0xff]  ;;  %v271_v15 = vpack.c.bf16 %v263_v12, %v262_v11  ;;  %v266_v17 = vld [vmem:[%s247_s7 + $0x50] sm:$0xff]  ;;  %v267_v18 = vld [vmem:[%s247_s7 + $0x58] sm:$0xff] }
  0x16   : > { %3144 = vmatmul.mubr.msk.bf16.vlgmr.msra.gmra.mxu1 %vm297_vm0, %v269_v9  ;;  %v272_v16 = vpack.c.bf16 %v265_v14, %v264_v13  ;;  %v273_v19 = vpack.c.bf16 %v267_v18, %v266_v17  ;;  %v406_v4 = vld [vmem:[%s4711_s3 + $0x18] sm:$0xff]  ;;  %v404_v8 = vld [vmem:[%s4711_s3 + $0x8] sm:$0xff] }
  0x17   : > { %3147 = vmatprep.mubr.msk.bf16.mxu1 %vm297_vm0, %v270_v10 }
  0x1e   : > { %3148 = vmatmul.mubr.msk.bf16.gmra.mxu1 %vm297_vm0, %v271_v15 }
  0x1f   : > { %3151 = vmatprep.mubr.msk.bf16.mxu1 %vm297_vm0, %v272_v16 }
  0x26   : > { %3152 = vmatmul.mubr.msk.bf16.gmra.mxu1 %vm297_vm0, %v273_v19 }
  0xd6   : > { %v3145_v20 = vpop.f32.mrf.mxu1 }
  0xd7   : > { %v359_v24 = vadd.f32 %v3145_v20, %v2959_v21 }
  0xd8   : > { %v350_v22 = vpop.f32.mrf.mxu1 }
  0xd9   : > { %v351_v27 = vadd.f32 %v2959_v21, %v350_v22 }
  0xda   : > { %v3146_v23 = vpop.f32.mrf.mxu1 }
  0xdb   : > { %v362_v25 = vadd.f32 %v3146_v23, %v2959_v21 }
  0xdc   : > { %v353_v26 = vpop.f32.mrf.mxu1 }
  0xdd   : > { %v3783_v28 = vpack.c.bf16 %v362_v25, %v359_v24  ;;  %v354_v29 = vadd.f32 %v2959_v21, %v353_v26 }
  0xde   : > { %v3149_v30 = vpop.f32.mrf.mxu1 }
  0xdf   : > { %v3785_v31 = vpack.c.bf16 %v354_v29, %v351_v27  ;;  %423 = vrot.lane.b32.xlu0 %v3783_v28, %s3703_s10  ;;  %v375_v34 = vadd.f32 %v3149_v30, %v2959_v21 }
  0xe0   : > { %v366_v32 = vpop.f32.mrf.mxu1 }
  0xe1   : > { %3159 = vmatprep.mubr.msk.bf16.mxu1 %vm425_vm1, %v3785_v31  ;;  %v367_v37 = vadd.f32 %v2959_v21, %v366_v32 }
  0xe2   : > { %v3150_v33 = vpop.f32.mrf.mxu1 }
  0xe3   : > { %v378_v35 = vadd.f32 %v3150_v33, %v2959_v21  ;;  %421 = vrot.lane.b32.xlu0 %v3785_v31, %s3703_s10 }
  0xe4   : > { %v369_v36 = vpop.f32.mrf.mxu1 }
  0xe5   : > { %v3791_v38 = vpack.c.bf16 %v378_v35, %v375_v34  ;;  %v370_v39 = vadd.f32 %v2959_v21, %v369_v36 }
  0xe6   : > { %v3153_v40 = vpop.f32.mrf.mxu1 }
  0xe7   : > { %v3793_v41 = vpack.c.bf16 %v370_v39, %v367_v37  ;;  %491 = vrot.lane.b32.xlu1 %v3791_v38, %s3703_s10  ;;  %v391_v44 = vadd.f32 %v3153_v40, %v2959_v21 }
  0xe8   : > { %v382_v42 = vpop.f32.mrf.mxu1 }
  0xe9   : > { %3167 = vmatprep.mubr.msk.bf16.mxu0 %vm425_vm1, %v3793_v41  ;;  %v383_v47 = vadd.f32 %v2959_v21, %v382_v42 }
  0xea   : > { %v3154_v43 = vpop.f32.mrf.mxu1 }
  0xeb   : > { %v394_v45 = vadd.f32 %v3154_v43, %v2959_v21  ;;  %489 = vrot.lane.b32.xlu1 %v3793_v41, %s3703_s10 }
  0xec   : > { %v385_v46 = vpop.f32.mrf.mxu1 }
  0xed   : > { %v3799_v48 = vpack.c.bf16 %v394_v45, %v391_v44  ;;  %v386_v49 = vadd.f32 %v2959_v21, %v385_v46 }
  0xef   : > { %v3801_v50 = vpack.c.bf16 %v386_v49, %v383_v47  ;;  %558 = vrot.lane.b32.xlu0 %v3799_v48, %s3703_s10 }
  0xf1   : > { %556 = vrot.lane.b32.xlu1 %v3801_v50, %s3703_s10  ;;  %s3708_s10 = smov 80  }
 0x151   : > { %v424_v51 = vpop.permute.xlu0 %423 }
 0x152   : > { %3363 = vmatprep.subr.msk.bf16.mxu1 %vm425_vm1, %v424_v51  ;;  %v436_v52 = vsel %vm425_vm1, %v424_v51, 0 }
 0x153   : > { %3156 = vmatpush3.bf16.xpose.msra.mxu1 %v436_v52 }
 0x155   : > { %v422_v53 = vpop.permute.xlu0 %421 }
 0x156   : > { %3364 = vmatprep.subr.msk.bf16.mxu1 %vm425_vm1, %v422_v53  ;;  %v433_v55 = vsel %vm425_vm1, %v422_v53, 0 }
 0x159   : > { %v492_v54 = vpop.permute.xlu1 %491 }
 0x15a   : > { %3365 = vmatprep.subr.msk.bf16.mxu0 %vm425_vm1, %v492_v54  ;;  %v503_v56 = vsel %vm425_vm1, %v492_v54, 0 }
 0x15b   : > { %3158 = vmatpush3.bf16.xpose.msra.mxu1 %v433_v55  ;;  %3164 = vmatpush3.bf16.xpose.msra.mxu0 %v503_v56 }
 0x15d   : > { %v490_v57 = vpop.permute.xlu1 %489 }
 0x15e   : > { %3366 = vmatprep.subr.msk.bf16.mxu0 %vm425_vm1, %v490_v57  ;;  %v500_v59 = vsel %vm425_vm1, %v490_v57, 0 }
 0x161   : > { %v559_v58 = vpop.permute.xlu0 %558 }
 0x162   : > { %3160 = vmatmul.mubr.msk.bf16.vlgmr.msra.gmra.mxu1 %vm425_vm1, %v3783_v28  ;;  %3367 = vmatprep.subr.msk.bf16.mxu1 %vm425_vm1, %v559_v58  ;;  %v570_v60 = vsel %vm425_vm1, %v559_v58, 0 }
 0x163   : > { %3166 = vmatpush3.bf16.xpose.msra.mxu0 %v500_v59  ;;  %3172 = vmatpush3.bf16.xpose.msra.mxu1 %v570_v60  ;;  %v557_v61 = vpop.permute.xlu1 %556 }
 0x164   : > { %3175 = vmatprep.mubr.msk.bf16.mxu1 %vm425_vm1, %v3801_v50  ;;  %3368 = vmatprep.subr.msk.bf16.mxu1 %vm425_vm1, %v557_v61  ;;  %v567_v62 = vsel %vm425_vm1, %v557_v61, 0 }
 0x16a   : > { %3168 = vmatmul.mubr.msk.bf16.vlgmr.msra.gmra.mxu0 %vm425_vm1, %v3791_v38 }
 0x16b   : > { %3174 = vmatpush3.bf16.xpose.msra.mxu1 %v567_v62 }
 0x172   : > { %3176 = vmatmul.mubr.msk.bf16.vlgmr.msra.gmra.mxu1 %vm425_vm1, %v3799_v48 }
 0x222   : > { %v3161_v0 = vpop.f32.mrf.mxu1 }
 0x223   : > { %v623_v2 = vadd.f32 %v3161_v0, %v405_v63 }
 0x224   : > { %v472_v3 = vpop.f32.mrf.mxu1 }
 0x225   : > { %v621_v5 = vadd.f32 %v472_v3, %v403_v1  ;;  %v639_v6 = vsel %vm297_vm0, %v623_v2, -inf }
 0x226   : > { %640 = vmax.xlane.f32.xlu1 %v639_v6  ;;  %v3162_v7 = vpop.f32.mrf.mxu1 }
 0x227   : > { %v3838_v9 = vadd.f32 %v3162_v7, %v406_v4  ;;  %v633_v10 = vsel %vm297_vm0, %v621_v5, -inf }
 0x228   : > { %634 = vmax.xlane.f32.xlu0 %v633_v10  ;;  %v475_v11 = vpop.f32.mrf.mxu1 }
 0x229   : > { %v622_v12 = vadd.f32 %v475_v11, %v404_v8  ;;  %v642_v15 = vsel %vm297_vm0, %v3838_v9, -inf }
 0x22a   : > { %v3169_v13 = vpop.f32.mrf.mxu0 }
 0x22b   : > { %v3841_v14 = vadd.f32 %v3169_v13, %v405_v63  ;;  %v636_v16 = vsel %vm297_vm0, %v622_v12, -inf }
 0x22c   : > { %v539_v17 = vpop.f32.mrf.mxu0  ;;  %643 = vmax.xlane.f32.xlu0 %v642_v15  ;;  %637 = vmax.xlane.f32.xlu1 %v636_v16 }
 0x22d   : > { %v625_v18 = vadd.f32 %v539_v17, %v403_v1  ;;  %v651_v21 = vsel %vm297_vm0, %v3841_v14, -inf }
 0x22e   : > { %v3170_v19 = vpop.f32.mrf.mxu0 }
 0x22f   : > { %v645_v20 = vsel %vm297_vm0, %v625_v18, -inf  ;;  %v3851_v25 = vadd.f32 %v3170_v19, %v406_v4 }
 0x230   : > { %v542_v22 = vpop.f32.mrf.mxu0  ;;  %646 = vmax.xlane.f32.xlu0 %v645_v20  ;;  %652 = vmax.xlane.f32.xlu1 %v651_v21 }
 0x231   : > { %v3849_v23 = vadd.f32 %v542_v22, %v404_v8  ;;  %v654_v34 = vsel %vm297_vm0, %v3851_v25, -inf }
 0x232   : > { %v3177_v24 = vpop.f32.mrf.mxu1 }
 0x233   : > { %v631_v26 = vadd.f32 %v3177_v24, %v405_v63  ;;  %v648_v27 = vsel %vm297_vm0, %v3849_v23, -inf }
 0x234   : > { %649 = vmax.xlane.f32.xlu0 %v648_v27  ;;  %v606_v29 = vpop.f32.mrf.mxu1 }
 0x235   : > { %v3855_v30 = vadd.f32 %v606_v29, %v403_v1  ;;  %v663_v32 = vsel %vm297_vm0, %v631_v26, -inf }
 0x236   : > { %664 = vmax.xlane.f32.xlu1 %v663_v32  ;;  %v3178_v33 = vpop.f32.mrf.mxu1 }
 0x237   : > { %v657_v37 = vsel %vm297_vm0, %v3855_v30, -inf  ;;  %v3864_v39 = vadd.f32 %v3178_v33, %v406_v4 }
 0x238   : > { %655 = vmax.xlane.f32.xlu0 %v654_v34  ;;  %v609_v35 = vpop.f32.mrf.mxu1 }
 0x239   : > { %v3860_v36 = vadd.f32 %v609_v35, %v404_v8  ;;  %v666_v42 = vsel %vm297_vm0, %v3864_v39, -inf }
 0x23a   : > { %658 = vmax.xlane.f32.xlu1 %v657_v37 }
 0x23b   : > { %v660_v40 = vsel %vm297_vm0, %v3860_v36, -inf }
 0x23c   : > { %661 = vmax.xlane.f32.xlu0 %v660_v40 }
 0x240   : > { %667 = vmax.xlane.f32.xlu0 %v666_v42 }
 0x24b   : > { %773 = vrot.lane.b32.xlu1 %v3783_v28, %s3704_s19 }
 0x24f   : > { %771 = vrot.lane.b32.xlu1 %v3785_v31, %s3704_s19 }
 0x253   : > { %832 = vrot.lane.b32.xlu1 %v3793_v41, %s3704_s19 }
 0x256   : > { %834 = vrot.lane.b32.xlu0 %v3791_v38, %s3704_s19 }
 0x257   : > { %960 = vrot.lane.b32.xlu1 %v3783_v28, %s3705_s20 }
 0x25a   : > { %895 = vrot.lane.b32.xlu0 %v3799_v48, %s3704_s19 }
 0x25b   : > { %958 = vrot.lane.b32.xlu1 %v3785_v31, %s3705_s20 }
 0x25e   : > { %893 = vrot.lane.b32.xlu0 %v3801_v50, %s3704_s19 }
 0x2af   : > { %v641_v43 = vpop.xlane.xlu1 %640 }
 0x2b0   : > { %v671_v44 = vsub.f32 %v623_v2, %v641_v43 }
 0x2b1   : > { %v635_v45 = vpop.xlane.xlu0 %634 }
 0x2b2   : > { %v685_v46 = vmul.f32 1.442695, %v671_v44  ;;  %v669_v47 = vsub.f32 %v621_v5, %v635_v45 }
 0x2b4   : > { %3503 = vpow2.f32 %v685_v46  ;;  %v681_v49 = vmul.f32 1.442695, %v669_v47 }
 0x2b5   : > { %v644_v51 = vpop.xlane.xlu0 %643  ;;  %v638_v52 = vpop.xlane.xlu1 %637 }
 0x2b6   : > { %3505 = vpow2.f32 %v681_v49  ;;  %v672_v53 = vsub.f32 %v3838_v9, %v644_v51  ;;  %v670_v54 = vsub.f32 %v622_v12, %v638_v52 }
 0x2b8   : > { %v687_v55 = vmul.f32 1.442695, %v672_v53  ;;  %v683_v56 = vmul.f32 1.442695, %v670_v54 }
 0x2b9   : > { %v647_v57 = vpop.xlane.xlu0 %646  ;;  %v653_v58 = vpop.xlane.xlu1 %652 }
 0x2ba   : > { %3507 = vpow2.f32 %v687_v55  ;;  %v673_v59 = vsub.f32 %v625_v18, %v647_v57  ;;  %v675_v60 = vsub.f32 %v3841_v14, %v653_v58 }
 0x2bb   : > { %3509 = vpow2.f32 %v683_v56 }
 0x2bc   : > { %v693_v61 = vmul.f32 1.442695, %v675_v60  ;;  %v689_v62 = vmul.f32 1.442695, %v673_v59 }
 0x2bd   : > { %v650_v63 = vpop.xlane.xlu0 %649 }
 0x2be   : > { %3511 = vpow2.f32 %v693_v61  ;;  %v674_v1 = vsub.f32 %v3849_v23, %v650_v63 }
 0x2bf   : > { %v665_v0 = vpop.xlane.xlu1 %664  ;;  %3513 = vpow2.f32 %v689_v62 }
 0x2c0   : > { %v679_v2 = vsub.f32 %v631_v26, %v665_v0  ;;  %v691_v10 = vmul.f32 1.442695, %v674_v1 }
 0x2c1   : > { %v3883_v3 = vpop.eup %3503  ;;  %v656_v4 = vpop.xlane.xlu0 %655 }
 0x2c2   : > { %v701_v5 = vmul.f32 1.442695, %v679_v2  ;;  %v676_v6 = vsub.f32 %v3851_v25, %v656_v4  ;;  %v711_v7 = vsel %vm297_vm0, %v3883_v3, 0.0 }
 0x2c3   : > { %v3888_v8 = vpop.eup %3505  ;;  %712 = vadd.xlane.f32.xlu1 %v711_v7  ;;  %v659_v9 = vpop.xlane.xlu1 %658 }
 0x2c4   : > { %v695_v11 = vmul.f32 1.442695, %v676_v6  ;;  %v677_v12 = vsub.f32 %v3855_v30, %v659_v9  ;;  %3515 = vpow2.f32 %v701_v5  ;;  %v705_v15 = vsel %vm297_vm0, %v3888_v8, 0.0 }
 0x2c5   : > { %v662_v13 = vpop.xlane.xlu0 %661 }
 0x2c6   : > { %3517 = vpow2.f32 %v695_v11  ;;  %v697_v14 = vmul.f32 1.442695, %v677_v12  ;;  %v678_v18 = vsub.f32 %v3860_v36, %v662_v13 }
 0x2c7   : > { %v3893_v16 = vpop.eup %3507  ;;  %706 = vadd.xlane.f32.xlu1 %v705_v15  ;;  %v774_v17 = vpop.permute.xlu1 %773  ;;  %3519 = vpow2.f32 %v691_v10 }
 0x2c8   : > { %3179 = vmatprep.subr.bf16.mxu0 %v774_v17  ;;  %v714_v19 = vsel %vm297_vm0, %v3893_v16, 0.0  ;;  %v3898_v20 = vpop.eup %3509  ;;  %3521 = vpow2.f32 %v697_v14  ;;  %v699_v25 = vmul.f32 1.442695, %v678_v18 }
 0x2c9   : > { %3180 = vmatpush3.bf16.msra.mxu0 %v774_v17  ;;  %715 = vadd.xlane.f32.xlu0 %v714_v19  ;;  %v668_v21 = vpop.xlane.xlu0 %667  ;;  %v708_v27 = vsel %vm297_vm0, %v3898_v20, 0.0 }
 0x2ca   : > { %v680_v22 = vsub.f32 %v3864_v39, %v668_v21 }
 0x2cb   : > { %v772_v23 = vpop.permute.xlu1 %771  ;;  %v3901_v24 = vpop.eup %3511 }
 0x2cc   : > { %v703_v26 = vmul.f32 1.442695, %v680_v22  ;;  %3181 = vmatprep.subr.bf16.mxu0 %v772_v23  ;;  %v723_v29 = vsel %vm297_vm0, %v3901_v24, 0.0  ;;  %v3907_v32 = vpop.eup %3513 }
 0x2cd   : > { %3182 = vmatpush3.bf16.msra.mxu0 %v772_v23  ;;  %709 = vadd.xlane.f32.xlu0 %v708_v27  ;;  %v835_v30 = vpop.permute.xlu0 %834  ;;  %v717_v34 = vsel %vm297_vm0, %v3907_v32, 0.0 }
 0x2ce   : > { %3523 = vpow2.f32 %v703_v26  ;;  %724 = vadd.xlane.f32.xlu1 %v723_v29  ;;  %3187 = vmatprep.subr.bf16.mxu1 %v835_v30 }
 0x2cf   : > { %v833_v33 = vpop.permute.xlu1 %832  ;;  %3188 = vmatpush3.bf16.msra.mxu1 %v835_v30  ;;  %3525 = vpow2.f32 %v699_v25 }
 0x2d0   : > { %3189 = vmatprep.subr.bf16.mxu1 %v833_v33 }
 0x2d1   : > { %v3911_v35 = vpop.permute.xlu0 %895  ;;  %v3913_v36 = vpop.eup %3515 }
 0x2d2   : > { %718 = vadd.xlane.f32.xlu1 %v717_v34  ;;  %3195 = vmatprep.subr.bf16.mxu0 %v3911_v35  ;;  %v735_v43 = vsel %vm297_vm0, %v3913_v36, 0.0 }
 0x2d3   : > { %v3916_v37 = vpop.eup %3517  ;;  %v3918_v39 = vpop.permute.xlu1 %960  ;;  %3190 = vmatpush3.bf16.msra.mxu1 %v833_v33 }
 0x2d4   : > { %3369 = vmatprep.subr.msk.bf16.mxu1 %vm425_vm1, %v3918_v39  ;;  %v726_v40 = vsel %vm297_vm0, %v3916_v37, 0.0  ;;  %v3924_v42 = vpop.eup %3519  ;;  %v972_v30 = vsel %vm425_vm1, %v3918_v39, 0 }
 0x2d5   : > { %727 = vadd.xlane.f32.xlu0 %v726_v40  ;;  %v3928_v44 = vpop.eup %3521  ;;  %v720_v45 = vsel %vm297_vm0, %v3924_v42, 0.0  ;;  %v894_v55 = vpop.permute.xlu0 %893 }
 0x2d6   : > { %736 = vadd.xlane.f32.xlu1 %v735_v43  ;;  %v729_v46 = vsel %vm297_vm0, %v3928_v44, 0.0 }
 0x2d7   : > { %v3956_v53 = vpop.permute.xlu1 %958 }
 0x2d9   : > { %721 = vadd.xlane.f32.xlu0 %v720_v45  ;;  %v969_v45 = vsel %vm425_vm1, %v3956_v53, 0 }
 0x2da   : > { %730 = vadd.xlane.f32.xlu1 %v729_v46 }
 0x2db   : > { %v3934_v47 = vpop.eup %3523 }
 0x2dc   : > { %v738_v49 = vsel %vm297_vm0, %v3934_v47, 0.0  ;;  %v3938_v51 = vpop.eup %3525 }
 0x2dd   : > { %739 = vadd.xlane.f32.xlu0 %v738_v49  ;;  %v732_v52 = vsel %vm297_vm0, %v3938_v51, 0.0 }
 0x2e1   : > { %733 = vadd.xlane.f32.xlu0 %v732_v52 }
 0x2eb   : > { %954 = vrot.lane.b32.xlu1 %v3785_v31, %s3706_s22 }
 0x2ef   : > { %1027 = vrot.lane.b32.xlu1 %v3793_v41, %s3705_s20 }
 0x2f3   : > { %1023 = vrot.lane.b32.xlu1 %v3793_v41, %s3706_s22 }
 0x2f7   : > { %1096 = vrot.lane.b32.xlu1 %v3801_v50, %s3705_s20  ;;  %1029 = vrot.lane.b32.xlu0 %v3791_v38, %s3705_s20 }
 0x2fb   : > { %1094 = vrot.lane.b32.xlu1 %v3799_v48, %s3706_s22  ;;  %956 = vrot.lane.b32.xlu0 %v3783_v28, %s3706_s22 }
 0x2ff   : > { %1098 = vrot.lane.b32.xlu0 %v3799_v48, %s3705_s20  ;;  %s3710_s20 = smov 48  }
 0x303   : > { %1025 = vrot.lane.b32.xlu0 %v3791_v38, %s3706_s22 }
 0x307   : > { %1092 = vrot.lane.b32.xlu0 %v3801_v50, %s3706_s22  ;;  %s3711_s22 = smov 72  }
 0x34c   : > { %v713_v54 = vpop.xlane.xlu1 %712 }
 0x350   : > { %v707_v56 = vpop.xlane.xlu1 %706 }
 0x352   : > { %v716_v57 = vpop.xlane.xlu0 %715 }
 0x353   : > { %3527 = vrcp.f32 %v716_v57 }
 0x354   : > { %3529 = vrcp.f32 %v707_v56 }
 0x355   : > { %3531 = vrcp.f32 %v713_v54 }
 0x356   : > { %v710_v58 = vpop.xlane.xlu0 %709 }
 0x357   : > { %v725_v59 = vpop.xlane.xlu1 %724  ;;  %3533 = vrcp.f32 %v710_v58 }
 0x35b   : > { %v719_v60 = vpop.xlane.xlu1 %718 }
 0x35e   : > { %v728_v61 = vpop.xlane.xlu0 %727 }
 0x35f   : > { %v737_v62 = vpop.xlane.xlu1 %736  ;;  %3535 = vrcp.f32 %v728_v61 }
 0x360   : > { %v3528_v63 = vpop.eup %3527  ;;  %3537 = vrcp.f32 %v719_v60 }
 0x361   : > { %v3530_v0 = vpop.eup %3529  ;;  %3539 = vrcp.f32 %v725_v59  ;;  %v756_v5 = vmul.f32 %v3528_v63, %v3893_v16 }
 0x362   : > { %v722_v1 = vpop.xlane.xlu0 %721  ;;  %v3532_v2 = vpop.eup %3531  ;;  %v753_v6 = vmul.f32 %v3530_v0, %v3888_v8 }
 0x363   : > { %3541 = vrcp.f32 %v722_v1  ;;  %v731_v9 = vpop.xlane.xlu1 %730  ;;  %v755_v11 = vmul.f32 %v3532_v2, %v3883_v3  ;;  %v409_v1 = vld [vmem:[%s4711_s3 + $0x30] sm:$0xff] }
 0x364   : > { %v3534_v4 = vpop.eup %3533 }
 0x365   : > { %v754_v7 = vmul.f32 %v3534_v4, %v3898_v20  ;;  %v766_v13 = vpack.c.bf16 %v756_v5, %v755_v11  ;;  %v407_v4 = vld [vmem:[%s4711_s3 + $0x20] sm:$0xff]  ;;  %v410_v11 = vld [vmem:[%s4711_s3 + $0x38] sm:$0xff] }
 0x366   : > { %v740_v10 = vpop.xlane.xlu0 %739 }
 0x367   : > { %v765_v12 = vpack.c.bf16 %v754_v7, %v753_v6  ;;  %3543 = vrcp.f32 %v740_v10  ;;  %v955_v22 = vpop.permute.xlu1 %954 }
 0x368   : > { %3545 = vrcp.f32 %v731_v9 }
 0x369   : > { %3183 = vmatprep.mubr.msk.bf16.mxu0 %vm297_vm0, %v765_v12  ;;  %3547 = vrcp.f32 %v737_v62 }
 0x36a   : > { %3184 = vmatmul.mubr.msk.bf16.vlgmr.msra.gmra.mxu0 %vm297_vm0, %v766_v13  ;;  %v734_v14 = vpop.xlane.xlu0 %733  ;;  %v408_v13 = vld [vmem:[%s4711_s3 + $0x28] sm:$0xff] }
 0x36b   : > { %3196 = vmatpush3.bf16.msra.mxu0 %v3911_v35  ;;  %3549 = vrcp.f32 %v734_v14  ;;  %v1028_v34 = vpop.permute.xlu1 %1027 }
 0x36c   : > { %3197 = vmatprep.subr.bf16.mxu0 %v894_v55  ;;  %v3536_v8 = vpop.eup %3535 }
 0x36d   : > { %v3538_v15 = vpop.eup %3537  ;;  %v760_v18 = vmul.f32 %v3536_v8, %v3916_v37 }
 0x36e   : > { %v1030_v16 = vpop.permute.xlu0 %1029  ;;  %v3540_v17 = vpop.eup %3539  ;;  %v757_v19 = vmul.f32 %v3538_v15, %v3907_v32 }
 0x36f   : > { %3198 = vmatpush3.bf16.msra.mxu0 %v894_v55  ;;  %v759_v21 = vmul.f32 %v3540_v17, %v3901_v24  ;;  %v1041_v46 = vsel %vm425_vm1, %v1030_v16, 0 }
 0x370   : > { %v3542_v3 = vpop.eup %3541  ;;  %3371 = vmatprep.subr.msk.bf16.mxu0 %vm425_vm1, %v1030_v16 }
 0x371   : > { %v758_v20 = vmul.f32 %v3542_v3, %v3924_v42  ;;  %v768_v25 = vpack.c.bf16 %v760_v18, %v759_v21 }
 0x372   : > { %v957_v27 = vpop.permute.xlu0 %956 }
 0x373   : > { %v767_v23 = vpack.c.bf16 %v758_v20, %v757_v19 }
 0x374   : > { %v3544_v26 = vpop.eup %3543 }
 0x375   : > { %3191 = vmatprep.mubr.msk.bf16.mxu1 %vm297_vm0, %v767_v23  ;;  %v3546_v29 = vpop.eup %3545  ;;  %v764_v24 = vmul.f32 %v3544_v26, %v3934_v47  ;;  %v1024_v47 = vpop.permute.xlu1 %1023 }
 0x376   : > { %3192 = vmatmul.mubr.msk.bf16.vlgmr.msra.gmra.mxu1 %vm297_vm0, %v768_v25  ;;  %v3548_v33 = vpop.eup %3547  ;;  %v761_v35 = vmul.f32 %v3546_v29, %v3928_v44  ;;  %v1099_v42 = vpop.permute.xlu0 %1098  ;;  %v1038_v44 = vsel %vm425_vm1, %v1028_v34, 0 }
 0x377   : > { %3204 = vmatpush3.bf16.xpose.msra.mxu1 %v972_v30  ;;  %3207 = vmatprep.mubr.msk.bf16.mxu1 %vm425_vm1, %v955_v22  ;;  %v763_v40 = vmul.f32 %v3548_v33, %v3913_v36  ;;  %v1110_v49 = vsel %vm425_vm1, %v1099_v42, 0 }
 0x378   : > { %v3550_v32 = vpop.eup %3549  ;;  %3370 = vmatprep.subr.msk.bf16.mxu1 %vm425_vm1, %v3956_v53 }
 0x379   : > { %v762_v37 = vmul.f32 %v3550_v32, %v3938_v51  ;;  %v770_v39 = vpack.c.bf16 %v764_v24, %v763_v40  ;;  %v1097_v51 = vpop.permute.xlu1 %1096 }
 0x37a   : > { %v1026_v36 = vpop.permute.xlu0 %1025  ;;  %v1107_v53 = vsel %vm425_vm1, %v1097_v51, 0 }
 0x37b   : > { %v769_v43 = vpack.c.bf16 %v762_v37, %v761_v35 }
 0x37d   : > { %3199 = vmatprep.mubr.msk.bf16.mxu0 %vm297_vm0, %v769_v43  ;;  %v1095_v54 = vpop.permute.xlu1 %1094 }
 0x37e   : > { %3200 = vmatmul.mubr.msk.bf16.vlgmr.msra.gmra.mxu0 %vm297_vm0, %v770_v39  ;;  %v1093_v52 = vpop.permute.xlu0 %1092 }
 0x37f   : > { %3206 = vmatpush3.bf16.xpose.msra.mxu1 %v969_v45  ;;  %3212 = vmatpush3.bf16.xpose.msra.mxu0 %v1041_v46 }
 0x380   : > { %3372 = vmatprep.subr.msk.bf16.mxu0 %vm425_vm1, %v1028_v34  ;;  %3215 = vmatprep.mubr.msk.bf16.mxu0 %vm425_vm1, %v1024_v47 }
 0x381   : > { %3373 = vmatprep.subr.msk.bf16.mxu1 %vm425_vm1, %v1099_v42 }
 0x386   : > { %3208 = vmatmul.mubr.msk.bf16.vlgmr.msra.gmra.mxu1 %vm425_vm1, %v957_v27 }
 0x387   : > { %3214 = vmatpush3.bf16.xpose.msra.mxu0 %v1038_v44  ;;  %3220 = vmatpush3.bf16.xpose.msra.mxu1 %v1110_v49 }
 0x388   : > { %3223 = vmatprep.mubr.msk.bf16.mxu1 %vm425_vm1, %v1093_v52  ;;  %3374 = vmatprep.subr.msk.bf16.mxu1 %vm425_vm1, %v1097_v51 }
 0x38e   : > { %3216 = vmatmul.mubr.msk.bf16.vlgmr.msra.gmra.mxu0 %vm425_vm1, %v1026_v36 }
 0x38f   : > { %3222 = vmatpush3.bf16.xpose.msra.mxu1 %v1107_v53 }
 0x396   : > { %3224 = vmatmul.mubr.msk.bf16.vlgmr.msra.gmra.mxu1 %vm425_vm1, %v1095_v54 }
 0x42a   : > { %v3997_v55 = vpop.f32.mrf.mxu0 }
 0x42c   : > { %v3999_v56 = vpop.f32.mrf.mxu0 }
 0x42e   : > { %v4003_v58 = vpop.f32.mrf.mxu0 }
 0x430   : > { %v4007_v60 = vpop.f32.mrf.mxu0 }
 0x436   : > { %v4001_v57 = vpop.f32.mrf.mxu1 }
 0x438   : > { %v4005_v59 = vpop.f32.mrf.mxu1 }
 0x43a   : > { %v4009_v61 = vpop.f32.mrf.mxu1 }
 0x43c   : > { %v4013_v63 = vpop.f32.mrf.mxu1 }
 0x43e   : > { %v4011_v62 = vpop.f32.mrf.mxu0 }
 0x43f   : > { %4715 = vst [vmem:[#allocation2_spill] sm:$0xff] %v4011_v62 }
 0x440   : > { %v4015_v0 = vpop.f32.mrf.mxu0 }
 0x441   : > { %4716 = vst [vmem:[#allocation3_spill] sm:$0xff] %v4015_v0 }
 0x442   : > { %v4025_v6 = vpop.f32.mrf.mxu0 }
 0x444   : > { %v4037_v14 = vpop.f32.mrf.mxu0 }
 0x445   : > { %4717 = vst [vmem:[#allocation4_spill] sm:$0xff] %v4037_v14 }
 0x446   : > { %v3209_v2 = vpop.f32.mrf.mxu1 }
 0x447   : > { %v4023_v5 = vadd.f32 %v3209_v2, %v409_v1 }
 0x448   : > { %v1008_v7 = vpop.f32.mrf.mxu1 }
 0x449   : > { %v4027_v9 = vadd.f32 %v1008_v7, %v407_v4  ;;  %v1179_v10 = vsel %vm297_vm0, %v4023_v5, -inf }
 0x44a   : > { %1180 = vmax.xlane.f32.xlu0 %v1179_v10  ;;  %v3210_v12 = vpop.f32.mrf.mxu1 }
 0x44b   : > { %v4039_v15 = vadd.f32 %v3210_v12, %v410_v11  ;;  %v1173_v17 = vsel %vm297_vm0, %v4027_v9, -inf }
 0x44c   : > { %v1011_v8 = vpop.f32.mrf.mxu1 }
 0x44d   : > { %v1162_v16 = vadd.f32 %v1011_v8, %v408_v13  ;;  %v1182_v21 = vsel %vm297_vm0, %v4039_v15, -inf }
 0x44e   : > { %1174 = vmax.xlane.f32.xlu0 %v1173_v17  ;;  %v3217_v3 = vpop.f32.mrf.mxu0 }
 0x44f   : > { %v1167_v18 = vadd.f32 %v3217_v3, %v409_v1  ;;  %v1176_v19 = vsel %vm297_vm0, %v1162_v16, -inf }
 0x450   : > { %1177 = vmax.xlane.f32.xlu1 %v1176_v19  ;;  %v1077_v20 = vpop.f32.mrf.mxu0 }
 0x451   : > { %v1165_v23 = vadd.f32 %v1077_v20, %v407_v4  ;;  %v1191_v25 = vsel %vm297_vm0, %v1167_v18, -inf }
 0x452   : > { %1183 = vmax.xlane.f32.xlu0 %v1182_v21  ;;  %v3218_v22 = vpop.f32.mrf.mxu0 }
 0x453   : > { %v4049_v30 = vadd.f32 %v3218_v22, %v410_v11  ;;  %v1185_v32 = vsel %vm297_vm0, %v1165_v23, -inf }
 0x454   : > { %1192 = vmax.xlane.f32.xlu1 %v1191_v25  ;;  %v1080_v26 = vpop.f32.mrf.mxu0 }
 0x455   : > { %v4047_v27 = vadd.f32 %v1080_v26, %v408_v13  ;;  %v1194_v40 = vsel %vm297_vm0, %v4049_v30, -inf }
 0x456   : > { %v3225_v29 = vpop.f32.mrf.mxu1 }
 0x457   : > { %v4051_v33 = vadd.f32 %v3225_v29, %v409_v1  ;;  %v1188_v24 = vsel %vm297_vm0, %v4047_v27, -inf }
 0x458   : > { %1186 = vmax.xlane.f32.xlu1 %v1185_v32  ;;  %1189 = vmax.xlane.f32.xlu0 %v1188_v24  ;;  %v1146_v34 = vpop.f32.mrf.mxu1 }
 0x459   : > { %v4056_v37 = vadd.f32 %v1146_v34, %v407_v4  ;;  %v1203_v42 = vsel %vm297_vm0, %v4051_v33, -inf }
 0x45a   : > { %v3226_v35 = vpop.f32.mrf.mxu1 }
 0x45b   : > { %v4064_v45 = vadd.f32 %v3226_v35, %v410_v11  ;;  %v1197_v46 = vsel %vm297_vm0, %v4056_v37, -inf }
 0x45c   : > { %1195 = vmax.xlane.f32.xlu0 %v1194_v40  ;;  %1204 = vmax.xlane.f32.xlu1 %v1203_v42  ;;  %v1149_v43 = vpop.f32.mrf.mxu1 }
 0x45d   : > { %v4062_v39 = vadd.f32 %v1149_v43, %v408_v13  ;;  %v1206_v36 = vsel %vm297_vm0, %v4064_v45, -inf }
 0x45f   : > { %v1200_v47 = vsel %vm297_vm0, %v4062_v39, -inf }
 0x460   : > { %1198 = vmax.xlane.f32.xlu1 %v1197_v46  ;;  %1201 = vmax.xlane.f32.xlu0 %v1200_v47 }
 0x464   : > { %1207 = vmax.xlane.f32.xlu0 %v1206_v36 }
 0x471   : > { %1313 = vrot.lane.b32.xlu1 %v3783_v28, %s3707_s9 }
 0x475   : > { %1374 = vrot.lane.b32.xlu1 %v3791_v38, %s3707_s9 }
 0x479   : > { %1372 = vrot.lane.b32.xlu1 %v3793_v41, %s3707_s9 }
 0x47a   : > { %1311 = vrot.lane.b32.xlu0 %v3785_v31, %s3707_s9 }
 0x47d   : > { %1500 = vrot.lane.b32.xlu1 %v3783_v28, %s3708_s10 }
 0x47e   : > { %1435 = vrot.lane.b32.xlu0 %v3799_v48, %s3707_s9 }
 0x481   : > { %1498 = vrot.lane.b32.xlu1 %v3785_v31, %s3708_s10 }
 0x482   : > { %1433 = vrot.lane.b32.xlu0 %v3801_v50, %s3707_s9 }
 0x4d3   : > { %v1181_v44 = vpop.xlane.xlu0 %1180 }
 0x4d4   : > { %v1211_v49 = vsub.f32 %v4023_v5, %v1181_v44 }
 0x4d6   : > { %v1225_v51 = vmul.f32 1.442695, %v1211_v49 }
 0x4d7   : > { %v1175_v52 = vpop.xlane.xlu0 %1174 }
 0x4d8   : > { %3551 = vpow2.f32 %v1225_v51  ;;  %v1209_v53 = vsub.f32 %v4027_v9, %v1175_v52 }
 0x4d9   : > { %v1178_v54 = vpop.xlane.xlu1 %1177 }
 0x4da   : > { %v1221_v1 = vmul.f32 1.442695, %v1209_v53  ;;  %v1210_v2 = vsub.f32 %v1162_v16, %v1178_v54 }
 0x4db   : > { %v1184_v4 = vpop.xlane.xlu0 %1183 }
 0x4dc   : > { %3553 = vpow2.f32 %v1221_v1  ;;  %v1212_v7 = vsub.f32 %v4039_v15, %v1184_v4  ;;  %v1223_v10 = vmul.f32 1.442695, %v1210_v2 }
 0x4dd   : > { %v1193_v11 = vpop.xlane.xlu1 %1192 }
 0x4de   : > { %v1227_v12 = vmul.f32 1.442695, %v1212_v7  ;;  %v1215_v13 = vsub.f32 %v1167_v18, %v1193_v11 }
 0x4e0   : > { %3555 = vpow2.f32 %v1227_v12  ;;  %v1233_v8 = vmul.f32 1.442695, %v1215_v13 }
 0x4e1   : > { %3557 = vpow2.f32 %v1223_v10  ;;  %v1187_v5 = vpop.xlane.xlu1 %1186  ;;  %v1190_v17 = vpop.xlane.xlu0 %1189 }
 0x4e2   : > { %3559 = vpow2.f32 %v1233_v8  ;;  %v1213_v3 = vsub.f32 %v1165_v23, %v1187_v5  ;;  %v1214_v16 = vsub.f32 %v4047_v27, %v1190_v17 }
 0x4e4   : > { %v1229_v19 = vmul.f32 1.442695, %v1213_v3  ;;  %v1231_v23 = vmul.f32 1.442695, %v1214_v16 }
 0x4e5   : > { %v4085_v9 = vpop.eup %3551  ;;  %v1205_v20 = vpop.xlane.xlu1 %1204 }
 0x4e6   : > { %v1196_v21 = vpop.xlane.xlu0 %1195  ;;  %3561 = vpow2.f32 %v1229_v19  ;;  %v1219_v15 = vsub.f32 %v4051_v33, %v1205_v20  ;;  %v1251_v18 = vsel %vm297_vm0, %v4085_v9, 0.0 }
 0x4e7   : > { %v1216_v22 = vsub.f32 %v4049_v30, %v1196_v21  ;;  %1252 = vadd.xlane.f32.xlu1 %v1251_v18 }
 0x4e8   : > { %v1241_v25 = vmul.f32 1.442695, %v1219_v15 }
 0x4e9   : > { %v1235_v26 = vmul.f32 1.442695, %v1216_v22  ;;  %v4092_v29 = vpop.eup %3553  ;;  %v1199_v32 = vpop.xlane.xlu1 %1198 }
 0x4ea   : > { %v1202_v24 = vpop.xlane.xlu0 %1201  ;;  %3563 = vpow2.f32 %v1241_v25  ;;  %v1217_v27 = vsub.f32 %v4056_v37, %v1199_v32  ;;  %v1245_v34 = vsel %vm297_vm0, %v4092_v29, 0.0 }
 0x4eb   : > { %3565 = vpow2.f32 %v1235_v26  ;;  %1246 = vadd.xlane.f32.xlu1 %v1245_v34  ;;  %v1218_v35 = vsub.f32 %v4062_v39, %v1202_v24 }
 0x4ec   : > { %v1237_v30 = vmul.f32 1.442695, %v1217_v27  ;;  %3567 = vpow2.f32 %v1231_v23 }
 0x4ed   : > { %v4097_v33 = vpop.eup %3555  ;;  %v1314_v40 = vpop.permute.xlu1 %1313  ;;  %v1239_v39 = vmul.f32 1.442695, %v1218_v35 }
 0x4ee   : > { %v1208_v42 = vpop.xlane.xlu0 %1207  ;;  %v4100_v43 = vpop.eup %3557  ;;  %3569 = vpow2.f32 %v1237_v30  ;;  %3227 = vmatprep.subr.bf16.mxu0 %v1314_v40  ;;  %v1254_v37 = vsel %vm297_vm0, %v4097_v33, 0.0 }
 0x4ef   : > { %v1220_v46 = vsub.f32 %v4064_v45, %v1208_v42  ;;  %v4105_v47 = vpop.eup %3559  ;;  %3228 = vmatpush3.bf16.msra.mxu0 %v1314_v40  ;;  %1255 = vadd.xlane.f32.xlu0 %v1254_v37  ;;  %v1248_v45 = vsel %vm297_vm0, %v4100_v43, 0.0 }
 0x4f0   : > { %v1263_v44 = vsel %vm297_vm0, %v4105_v47, 0.0 }
 0x4f1   : > { %v1243_v36 = vmul.f32 1.442695, %v1220_v46  ;;  %1264 = vadd.xlane.f32.xlu1 %v1263_v44  ;;  %v4113_v52 = vpop.permute.xlu1 %1374 }
 0x4f2   : > { %v1312_v49 = vpop.permute.xlu0 %1311 }
 0x4f3   : > { %3571 = vpow2.f32 %v1243_v36  ;;  %3229 = vmatprep.subr.bf16.mxu0 %v1312_v49  ;;  %v4111_v51 = vpop.eup %3561  ;;  %1249 = vadd.xlane.f32.xlu0 %v1248_v45 }
 0x4f4   : > { %3230 = vmatpush3.bf16.msra.mxu0 %v1312_v49  ;;  %v1257_v53 = vsel %vm297_vm0, %v4111_v51, 0.0  ;;  %3573 = vpow2.f32 %v1239_v39 }
 0x4f5   : > { %3235 = vmatprep.subr.bf16.mxu0 %v4113_v52  ;;  %1258 = vadd.xlane.f32.xlu1 %v1257_v53  ;;  %v1373_v16 = vpop.permute.xlu1 %1372 }
 0x4f6   : > { %v1436_v54 = vpop.permute.xlu0 %1435 }
 0x4f7   : > { %3243 = vmatprep.subr.bf16.mxu1 %v1436_v54  ;;  %v4118_v1 = vpop.eup %3563 }
 0x4f8   : > { %3244 = vmatpush3.bf16.msra.mxu1 %v1436_v54  ;;  %v4120_v2 = vpop.eup %3565  ;;  %v1275_v4 = vsel %vm297_vm0, %v4118_v1, 0.0 }
 0x4f9   : > { %1276 = vadd.xlane.f32.xlu1 %v1275_v4  ;;  %v1266_v7 = vsel %vm297_vm0, %v4120_v2, 0.0  ;;  %v4126_v11 = vpop.eup %3567  ;;  %v1501_v20 = vpop.permute.xlu1 %1500 }
 0x4fa   : > { %v1434_v10 = vpop.permute.xlu0 %1433  ;;  %1267 = vadd.xlane.f32.xlu0 %v1266_v7  ;;  %v1260_v8 = vsel %vm297_vm0, %v4126_v11, 0.0 }
 0x4fb   : > { %3245 = vmatprep.subr.bf16.mxu1 %v1434_v10  ;;  %v4128_v12 = vpop.eup %3569 }
 0x4fc   : > { %3246 = vmatpush3.bf16.msra.mxu1 %v1434_v10  ;;  %v1269_v13 = vsel %vm297_vm0, %v4128_v12, 0.0 }
 0x4fd   : > { %1270 = vadd.xlane.f32.xlu1 %v1269_v13  ;;  %v4156_v21 = vpop.permute.xlu1 %1498 }
 0x4fe   : > { %1261 = vadd.xlane.f32.xlu0 %v1260_v8 }
 0x500   : > { %v4134_v5 = vpop.eup %3571 }
 0x501   : > { %v1278_v17 = vsel %vm297_vm0, %v4134_v5, 0.0  ;;  %v4138_v3 = vpop.eup %3573 }
 0x502   : > { %1279 = vadd.xlane.f32.xlu0 %v1278_v17  ;;  %v1272_v19 = vsel %vm297_vm0, %v4138_v3, 0.0 }
 0x506   : > { %1273 = vadd.xlane.f32.xlu0 %v1272_v19 }
 0x50e   : > { %1494 = vrot.lane.b32.xlu1 %v3785_v31, %s3709_s11 }
 0x512   : > { %1567 = vrot.lane.b32.xlu1 %v3793_v41, %s3708_s10 }
 0x516   : > { %1563 = vrot.lane.b32.xlu1 %v3793_v41, %s3709_s11 }
 0x51a   : > { %1636 = vrot.lane.b32.xlu1 %v3801_v50, %s3708_s10 }
 0x51c   : > { %1569 = vrot.lane.b32.xlu0 %v3791_v38, %s3708_s10 }
 0x51e   : > { %1634 = vrot.lane.b32.xlu1 %v3799_v48, %s3709_s11 }
 0x520   : > { %1496 = vrot.lane.b32.xlu0 %v3783_v28, %s3709_s11 }
 0x524   : > { %1638 = vrot.lane.b32.xlu0 %v3799_v48, %s3708_s10  ;;  %s3713_s10 = smov 40  }
 0x528   : > { %1565 = vrot.lane.b32.xlu0 %v3791_v38, %s3709_s11 }
 0x52c   : > { %1632 = vrot.lane.b32.xlu0 %v3801_v50, %s3709_s11  ;;  %s3714_s11 = smov 8  }
 0x570   : > { %v1253_v15 = vpop.xlane.xlu1 %1252 }
 0x574   : > { %v1247_v22 = vpop.xlane.xlu1 %1246 }
 0x578   : > { %v1256_v18 = vpop.xlane.xlu0 %1255 }
 0x579   : > { %3575 = vrcp.f32 %v1256_v18 }
 0x57a   : > { %v1265_v25 = vpop.xlane.xlu1 %1264  ;;  %3577 = vrcp.f32 %v1247_v22 }
 0x57b   : > { %3579 = vrcp.f32 %v1253_v15 }
 0x57c   : > { %v1250_v26 = vpop.xlane.xlu0 %1249 }
 0x57d   : > { %3581 = vrcp.f32 %v1250_v26 }
 0x57e   : > { %v1259_v23 = vpop.xlane.xlu1 %1258 }
 0x582   : > { %v1277_v24 = vpop.xlane.xlu1 %1276 }
 0x583   : > { %v1268_v32 = vpop.xlane.xlu0 %1267 }
 0x584   : > { %3583 = vrcp.f32 %v1268_v32 }
 0x585   : > { %3585 = vrcp.f32 %v1259_v23 }
 0x586   : > { %v3576_v27 = vpop.eup %3575  ;;  %3587 = vrcp.f32 %v1265_v25  ;;  %v1271_v46 = vpop.xlane.xlu1 %1270 }
 0x587   : > { %v1262_v34 = vpop.xlane.xlu0 %1261  ;;  %v3578_v30 = vpop.eup %3577  ;;  %v1296_v42 = vmul.f32 %v3576_v27, %v4097_v33 }
 0x588   : > { %3589 = vrcp.f32 %v1262_v34  ;;  %v3580_v35 = vpop.eup %3579  ;;  %v1293_v36 = vmul.f32 %v3578_v30, %v4092_v29 }
 0x589   : > { %v1295_v39 = vmul.f32 %v3580_v35, %v4085_v9 }
 0x58a   : > { %v3582_v40 = vpop.eup %3581 }
 0x58b   : > { %v1280_v37 = vpop.xlane.xlu0 %1279  ;;  %v1294_v44 = vmul.f32 %v3582_v40, %v4100_v43  ;;  %v1306_v45 = vpack.c.bf16 %v1296_v42, %v1295_v39 }
 0x58c   : > { %3591 = vrcp.f32 %v1280_v37 }
 0x58d   : > { %v1305_v49 = vpack.c.bf16 %v1294_v44, %v1293_v36  ;;  %3593 = vrcp.f32 %v1271_v46 }
 0x58e   : > { %3595 = vrcp.f32 %v1277_v24  ;;  %v1509_v24 = vsel %vm425_vm1, %v4156_v21, 0 }
 0x58f   : > { %v1274_v53 = vpop.xlane.xlu0 %1273  ;;  %3231 = vmatprep.mubr.msk.bf16.mxu0 %vm297_vm0, %v1305_v49 }
 0x590   : > { %3597 = vrcp.f32 %v1274_v53  ;;  %3232 = vmatmul.mubr.msk.bf16.vlgmr.msra.gmra.mxu0 %vm297_vm0, %v1306_v45 }
 0x591   : > { %3236 = vmatpush3.bf16.msra.mxu0 %v4113_v52  ;;  %v3584_v33 = vpop.eup %3583  ;;  %v1495_v52 = vpop.permute.xlu1 %1494 }
 0x592   : > { %3237 = vmatprep.subr.bf16.mxu0 %v1373_v16  ;;  %v3586_v29 = vpop.eup %3585  ;;  %v1300_v4 = vmul.f32 %v3584_v33, %v4120_v2  ;;  %v1512_v2 = vsel %vm425_vm1, %v1501_v20, 0 }
 0x593   : > { %v1570_v54 = vpop.permute.xlu0 %1569  ;;  %v3588_v43 = vpop.eup %3587  ;;  %v1297_v7 = vmul.f32 %v3586_v29, %v4111_v51 }
 0x594   : > { %3377 = vmatprep.subr.msk.bf16.mxu1 %vm425_vm1, %v1570_v54  ;;  %v1299_v13 = vmul.f32 %v3588_v43, %v4105_v47  ;;  %v1581_v27 = vsel %vm425_vm1, %v1570_v54, 0 }
 0x595   : > { %v3590_v9 = vpop.eup %3589  ;;  %3238 = vmatpush3.bf16.msra.mxu0 %v1373_v16 }
 0x596   : > { %3375 = vmatprep.subr.msk.bf16.mxu0 %vm425_vm1, %v1501_v20  ;;  %v1298_v10 = vmul.f32 %v3590_v9, %v4126_v11  ;;  %v1308_v17 = vpack.c.bf16 %v1300_v4, %v1299_v13  ;;  %v1568_v11 = vpop.permute.xlu1 %1567 }
 0x597   : > { %v1497_v15 = vpop.permute.xlu0 %1496 }
 0x598   : > { %v1307_v8 = vpack.c.bf16 %v1298_v10, %v1297_v7  ;;  %v413_v10 = vld [vmem:[%s4711_s3 + $0x50] sm:$0xff] }
 0x599   : > { %v3592_v19 = vpop.eup %3591 }
 0x59a   : > { %3239 = vmatprep.mubr.msk.bf16.mxu0 %vm297_vm0, %v1307_v8  ;;  %v3594_v22 = vpop.eup %3593  ;;  %v1304_v47 = vmul.f32 %v3592_v19, %v4134_v5  ;;  %v1564_v5 = vpop.permute.xlu1 %1563  ;;  %v411_v8 = vld [vmem:[%s4711_s3 + $0x40] sm:$0xff] }
 0x59b   : > { %3240 = vmatmul.mubr.msk.bf16.vlgmr.msra.gmra.mxu0 %vm297_vm0, %v1308_v17  ;;  %v3596_v16 = vpop.eup %3595  ;;  %v1301_v18 = vmul.f32 %v3594_v22, %v4128_v12  ;;  %v1639_v23 = vpop.permute.xlu0 %1638  ;;  %v1578_v12 = vsel %vm425_vm1, %v1568_v11, 0 }
 0x59c   : > { %3252 = vmatpush3.bf16.xpose.msra.mxu0 %v1512_v2  ;;  %3255 = vmatprep.mubr.msk.bf16.mxu0 %vm425_vm1, %v1495_v52  ;;  %v1303_v26 = vmul.f32 %v3596_v16, %v4118_v1  ;;  %v414_v2 = vld [vmem:[%s4711_s3 + $0x58] sm:$0xff] }
 0x59d   : > { %v3598_v51 = vpop.eup %3597  ;;  %3376 = vmatprep.subr.msk.bf16.mxu0 %vm425_vm1, %v4156_v21 }
 0x59e   : > { %v1302_v25 = vmul.f32 %v3598_v51, %v4138_v3  ;;  %v1310_v20 = vpack.c.bf16 %v1304_v47, %v1303_v26  ;;  %v1650_v3 = vsel %vm425_vm1, %v1639_v23, 0  ;;  %v1637_v34 = vpop.permute.xlu1 %1636  ;;  %v412_v51 = vld [vmem:[%s4711_s3 + $0x48] sm:$0xff] }
 0x59f   : > { %v1566_v1 = vpop.permute.xlu0 %1565  ;;  %v1647_v30 = vsel %vm425_vm1, %v1637_v34, 0 }
 0x5a0   : > { %v1309_v32 = vpack.c.bf16 %v1302_v25, %v1301_v18 }
 0x5a2   : > { %3247 = vmatprep.mubr.msk.bf16.mxu1 %vm297_vm0, %v1309_v32  ;;  %v1635_v35 = vpop.permute.xlu1 %1634 }
 0x5a3   : > { %3248 = vmatmul.mubr.msk.bf16.vlgmr.msra.gmra.mxu1 %vm297_vm0, %v1310_v20  ;;  %v1633_v21 = vpop.permute.xlu0 %1632 }
 0x5a4   : > { %3254 = vmatpush3.bf16.xpose.msra.mxu0 %v1509_v24  ;;  %3260 = vmatpush3.bf16.xpose.msra.mxu1 %v1581_v27 }
 0x5a5   : > { %3378 = vmatprep.subr.msk.bf16.mxu1 %vm425_vm1, %v1568_v11  ;;  %3263 = vmatprep.mubr.msk.bf16.mxu1 %vm425_vm1, %v1564_v5 }
 0x5a6   : > { %3379 = vmatprep.subr.msk.bf16.mxu0 %vm425_vm1, %v1639_v23 }
 0x5ab   : > { %3256 = vmatmul.mubr.msk.bf16.vlgmr.msra.gmra.mxu0 %vm425_vm1, %v1497_v15 }
 0x5ac   : > { %3262 = vmatpush3.bf16.xpose.msra.mxu1 %v1578_v12  ;;  %3268 = vmatpush3.bf16.xpose.msra.mxu0 %v1650_v3 }
 0x5ad   : > { %3271 = vmatprep.mubr.msk.bf16.mxu0 %vm425_vm1, %v1633_v21  ;;  %3380 = vmatprep.subr.msk.bf16.mxu0 %vm425_vm1, %v1637_v34 }
 0x5b3   : > { %3264 = vmatmul.mubr.msk.bf16.vlgmr.msra.gmra.mxu1 %vm425_vm1, %v1566_v1 }
 0x5b4   : > { %3270 = vmatpush3.bf16.xpose.msra.mxu0 %v1647_v30 }
 0x5bb   : > { %3272 = vmatmul.mubr.msk.bf16.vlgmr.msra.gmra.mxu0 %vm425_vm1, %v1635_v35 }
 0x650   : > { %v4197_v40 = vpop.f32.mrf.mxu0 }
 0x652   : > { %v4199_v42 = vpop.f32.mrf.mxu0 }
 0x654   : > { %v4201_v46 = vpop.f32.mrf.mxu0 }
 0x656   : > { %v4205_v36 = vpop.f32.mrf.mxu0 }
 0x65b   : > { %v4209_v39 = vpop.f32.mrf.mxu0 }
 0x65d   : > { %v4211_v49 = vpop.f32.mrf.mxu0 }
 0x65f   : > { %v4213_v45 = vpop.f32.mrf.mxu0 }
 0x661   : > { %v4217_v33 = vpop.f32.mrf.mxu0 }
 0x663   : > { %v4221_v54 = vpop.f32.mrf.mxu1 }
 0x665   : > { %v4223_v43 = vpop.f32.mrf.mxu1 }
 0x667   : > { %v4225_v9 = vpop.f32.mrf.mxu1 }
 0x669   : > { %v4229_v7 = vpop.f32.mrf.mxu1 }
 0x66b   : > { %v3257_v52 = vpop.f32.mrf.mxu0 }
 0x66c   : > { %v1703_v17 = vadd.f32 %v3257_v52, %v413_v10 }
 0x66d   : > { %v1548_v19 = vpop.f32.mrf.mxu0 }
 0x66e   : > { %v4239_v15 = vadd.f32 %v1548_v19, %v411_v8  ;;  %v1719_v22 = vsel %vm297_vm0, %v1703_v17, -inf }
 0x66f   : > { %1720 = vmax.xlane.f32.xlu0 %v1719_v22  ;;  %v3258_v16 = vpop.f32.mrf.mxu0 }
 0x670   : > { %v4248_v11 = vadd.f32 %v3258_v16, %v414_v2  ;;  %v1713_v25 = vsel %vm297_vm0, %v4239_v15, -inf }
 0x671   : > { %v1551_v47 = vpop.f32.mrf.mxu0 }
 0x672   : > { %v1702_v18 = vadd.f32 %v1551_v47, %v412_v51  ;;  %v1722_v24 = vsel %vm297_vm0, %v4248_v11, -inf }
 0x673   : > { %1714 = vmax.xlane.f32.xlu0 %v1713_v25  ;;  %v3265_v26 = vpop.f32.mrf.mxu1 }
 0x674   : > { %v1707_v23 = vadd.f32 %v3265_v26, %v413_v10  ;;  %v1716_v32 = vsel %vm297_vm0, %v1702_v18, -inf }
 0x675   : > { %1717 = vmax.xlane.f32.xlu1 %v1716_v32  ;;  %v1617_v20 = vpop.f32.mrf.mxu1 }
 0x676   : > { %v1705_v5 = vadd.f32 %v1617_v20, %v411_v8  ;;  %v1731_v1 = vsel %vm297_vm0, %v1707_v23, -inf }
 0x677   : > { %1723 = vmax.xlane.f32.xlu0 %v1722_v24  ;;  %v3266_v27 = vpop.f32.mrf.mxu1 }
 0x678   : > { %v4258_v21 = vadd.f32 %v3266_v27, %v414_v2  ;;  %v1725_v35 = vsel %vm297_vm0, %v1705_v5, -inf }
 0x679   : > { %1732 = vmax.xlane.f32.xlu1 %v1731_v1  ;;  %v1620_v12 = vpop.f32.mrf.mxu1 }
 0x67a   : > { %v4256_v3 = vadd.f32 %v1620_v12, %v412_v51  ;;  %v1734_v47 = vsel %vm297_vm0, %v4258_v21, -inf }
 0x67b   : > { %v3273_v34 = vpop.f32.mrf.mxu0 }
 0x67c   : > { %v4260_v30 = vadd.f32 %v3273_v34, %v413_v10  ;;  %v1728_v52 = vsel %vm297_vm0, %v4256_v3, -inf }
 0x67d   : > { %1726 = vmax.xlane.f32.xlu1 %v1725_v35  ;;  %1729 = vmax.xlane.f32.xlu0 %v1728_v52  ;;  %v1686_v19 = vpop.f32.mrf.mxu0 }
 0x67e   : > { %v4265_v16 = vadd.f32 %v1686_v19, %v411_v8  ;;  %v1743_v25 = vsel %vm297_vm0, %v4260_v30, -inf }
 0x67f   : > { %v3274_v22 = vpop.f32.mrf.mxu0 }
 0x680   : > { %v4273_v32 = vadd.f32 %v3274_v22, %v414_v2  ;;  %v1737_v20 = vsel %vm297_vm0, %v4265_v16, -inf }
 0x681   : > { %1735 = vmax.xlane.f32.xlu0 %v1734_v47  ;;  %1744 = vmax.xlane.f32.xlu1 %v1743_v25  ;;  %v1689_v10 = vpop.f32.mrf.mxu0 }
 0x682   : > { %v4271_v26 = vadd.f32 %v1689_v10, %v412_v51  ;;  %v1746_v24 = vsel %vm297_vm0, %v4273_v32, -inf }
 0x684   : > { %v1740_v8 = vsel %vm297_vm0, %v4271_v26, -inf }
 0x685   : > { %1738 = vmax.xlane.f32.xlu1 %v1737_v20  ;;  %1741 = vmax.xlane.f32.xlu0 %v1740_v8 }
 0x689   : > { %1747 = vmax.xlane.f32.xlu0 %v1746_v24 }
 0x696   : > { %1853 = vrot.lane.b32.xlu1 %v3783_v28, %s3710_s20 }
 0x69a   : > { %1914 = vrot.lane.b32.xlu1 %v3791_v38, %s3710_s20 }
 0x69e   : > { %1912 = vrot.lane.b32.xlu1 %v3793_v41, %s3710_s20 }
 0x69f   : > { %1851 = vrot.lane.b32.xlu0 %v3785_v31, %s3710_s20 }
 0x6a2   : > { %2040 = vrot.lane.b32.xlu1 %v3783_v28, %s3711_s22 }
 0x6a3   : > { %1975 = vrot.lane.b32.xlu0 %v3799_v48, %s3710_s20 }
 0x6a6   : > { %2038 = vrot.lane.b32.xlu1 %v3785_v31, %s3711_s22 }
 0x6a7   : > { %1973 = vrot.lane.b32.xlu0 %v3801_v50, %s3710_s20 }
 0x6f8   : > { %v1721_v2 = vpop.xlane.xlu0 %1720 }
 0x6f9   : > { %v1751_v51 = vsub.f32 %v1703_v17, %v1721_v2 }
 0x6fb   : > { %v1765_v27 = vmul.f32 1.442695, %v1751_v51 }
 0x6fc   : > { %v1715_v1 = vpop.xlane.xlu0 %1714 }
 0x6fd   : > { %3599 = vpow2.f32 %v1765_v27  ;;  %v1749_v12 = vsub.f32 %v4239_v15, %v1715_v1 }
 0x6fe   : > { %v1718_v34 = vpop.xlane.xlu1 %1717 }
 0x6ff   : > { %v1761_v35 = vmul.f32 1.442695, %v1749_v12  ;;  %v1750_v52 = vsub.f32 %v1702_v18, %v1718_v34 }
 0x700   : > { %v1724_v19 = vpop.xlane.xlu0 %1723 }
 0x701   : > { %3601 = vpow2.f32 %v1761_v35  ;;  %v1752_v22 = vsub.f32 %v4248_v11, %v1724_v19  ;;  %v1763_v47 = vmul.f32 1.442695, %v1750_v52 }
 0x702   : > { %v1733_v25 = vpop.xlane.xlu1 %1732 }
 0x703   : > { %v1767_v10 = vmul.f32 1.442695, %v1752_v22  ;;  %v1755_v20 = vsub.f32 %v1707_v23, %v1733_v25 }
 0x705   : > { %3603 = vpow2.f32 %v1767_v10  ;;  %v1773_v8 = vmul.f32 1.442695, %v1755_v20 }
 0x706   : > { %3605 = vpow2.f32 %v1763_v47  ;;  %v1727_v17 = vpop.xlane.xlu1 %1726  ;;  %v1730_v24 = vpop.xlane.xlu0 %1729 }
 0x707   : > { %3607 = vpow2.f32 %v1773_v8  ;;  %v1753_v2 = vsub.f32 %v1705_v5, %v1727_v17  ;;  %v1754_v18 = vsub.f32 %v4256_v3, %v1730_v24 }
 0x709   : > { %v1769_v51 = vmul.f32 1.442695, %v1753_v2  ;;  %v1771_v5 = vmul.f32 1.442695, %v1754_v18 }
 0x70a   : > { %v4293_v15 = vpop.eup %3599  ;;  %v1745_v27 = vpop.xlane.xlu1 %1744 }
 0x70b   : > { %v1736_v1 = vpop.xlane.xlu0 %1735  ;;  %3609 = vpow2.f32 %v1769_v51  ;;  %v1759_v11 = vsub.f32 %v4260_v30, %v1745_v27  ;;  %v1791_v23 = vsel %vm297_vm0, %v4293_v15, 0.0 }
 0x70c   : > { %v1756_v12 = vsub.f32 %v4258_v21, %v1736_v1  ;;  %1792 = vadd.xlane.f32.xlu1 %v1791_v23 }
 0x70d   : > { %v1781_v34 = vmul.f32 1.442695, %v1759_v11 }
 0x70e   : > { %v1775_v35 = vmul.f32 1.442695, %v1756_v12  ;;  %v4300_v52 = vpop.eup %3601  ;;  %v1739_v19 = vpop.xlane.xlu1 %1738 }
 0x70f   : > { %v1742_v22 = vpop.xlane.xlu0 %1741  ;;  %3611 = vpow2.f32 %v1781_v34  ;;  %v1757_v3 = vsub.f32 %v4265_v16, %v1739_v19  ;;  %v1785_v47 = vsel %vm297_vm0, %v4300_v52, 0.0 }
 0x710   : > { %3613 = vpow2.f32 %v1775_v35  ;;  %1786 = vadd.xlane.f32.xlu1 %v1785_v47  ;;  %v1758_v25 = vsub.f32 %v4271_v26, %v1742_v22 }
 0x711   : > { %v1777_v21 = vmul.f32 1.442695, %v1757_v3  ;;  %3615 = vpow2.f32 %v1771_v5 }
 0x712   : > { %v4305_v30 = vpop.eup %3603  ;;  %v1854_v10 = vpop.permute.xlu1 %1853  ;;  %v1779_v26 = vmul.f32 1.442695, %v1758_v25 }
 0x713   : > { %v1748_v20 = vpop.xlane.xlu0 %1747  ;;  %v4308_v8 = vpop.eup %3605  ;;  %3617 = vpow2.f32 %v1777_v21  ;;  %3275 = vmatprep.subr.bf16.mxu1 %v1854_v10  ;;  %v1794_v16 = vsel %vm297_vm0, %v4305_v30, 0.0 }
 0x714   : > { %v1760_v17 = vsub.f32 %v4273_v32, %v1748_v20  ;;  %v4313_v24 = vpop.eup %3607  ;;  %3276 = vmatpush3.bf16.msra.mxu1 %v1854_v10  ;;  %1795 = vadd.xlane.f32.xlu0 %v1794_v16  ;;  %v1788_v32 = vsel %vm297_vm0, %v4308_v8, 0.0 }
 0x715   : > { %v1803_v51 = vsel %vm297_vm0, %v4313_v24, 0.0 }
 0x716   : > { %v1783_v2 = vmul.f32 1.442695, %v1760_v17  ;;  %1804 = vadd.xlane.f32.xlu1 %v1803_v51  ;;  %v4321_v1 = vpop.permute.xlu1 %1914 }
 0x717   : > { %v1852_v18 = vpop.permute.xlu0 %1851 }
 0x718   : > { %3619 = vpow2.f32 %v1783_v2  ;;  %3277 = vmatprep.subr.bf16.mxu1 %v1852_v18  ;;  %v4319_v27 = vpop.eup %3609  ;;  %1789 = vadd.xlane.f32.xlu0 %v1788_v32 }
 0x719   : > { %3278 = vmatpush3.bf16.msra.mxu1 %v1852_v18  ;;  %v1797_v11 = vsel %vm297_vm0, %v4319_v27, 0.0  ;;  %3621 = vpow2.f32 %v1779_v26 }
 0x71a   : > { %3283 = vmatprep.subr.bf16.mxu1 %v4321_v1  ;;  %1798 = vadd.xlane.f32.xlu1 %v1797_v11  ;;  %v1913_v16 = vpop.permute.xlu1 %1912 }
 0x71b   : > { %v1976_v12 = vpop.permute.xlu0 %1975 }
 0x71c   : > { %3291 = vmatprep.subr.bf16.mxu0 %v1976_v12  ;;  %v4326_v23 = vpop.eup %3611 }
 0x71d   : > { %3292 = vmatpush3.bf16.msra.mxu0 %v1976_v12  ;;  %v4328_v34 = vpop.eup %3613  ;;  %v1815_v35 = vsel %vm297_vm0, %v4326_v23, 0.0 }
 0x71e   : > { %1816 = vadd.xlane.f32.xlu1 %v1815_v35  ;;  %v1806_v5 = vsel %vm297_vm0, %v4328_v34, 0.0  ;;  %v4334_v22 = vpop.eup %3615  ;;  %v2041_v2 = vpop.permute.xlu1 %2040 }
 0x71f   : > { %v1974_v19 = vpop.permute.xlu0 %1973  ;;  %1807 = vadd.xlane.f32.xlu0 %v1806_v5  ;;  %v1800_v21 = vsel %vm297_vm0, %v4334_v22, 0.0 }
 0x720   : > { %3293 = vmatprep.subr.bf16.mxu0 %v1974_v19  ;;  %v4336_v3 = vpop.eup %3617 }
 0x721   : > { %3294 = vmatpush3.bf16.msra.mxu0 %v1974_v19  ;;  %v1809_v47 = vsel %vm297_vm0, %v4336_v3, 0.0 }
 0x722   : > { %1810 = vadd.xlane.f32.xlu1 %v1809_v47  ;;  %v4364_v51 = vpop.permute.xlu1 %2038 }
 0x723   : > { %1801 = vadd.xlane.f32.xlu0 %v1800_v21 }
 0x725   : > { %v4342_v25 = vpop.eup %3619 }
 0x726   : > { %v1818_v10 = vsel %vm297_vm0, %v4342_v25, 0.0  ;;  %v4346_v20 = vpop.eup %3621 }
 0x727   : > { %1819 = vadd.xlane.f32.xlu0 %v1818_v10  ;;  %v1812_v17 = vsel %vm297_vm0, %v4346_v20, 0.0 }
 0x72b   : > { %1813 = vadd.xlane.f32.xlu0 %v1812_v17 }
 0x733   : > { %2034 = vrot.lane.b32.xlu1 %v3785_v31, %s3712_s23 }
 0x737   : > { %2107 = vrot.lane.b32.xlu1 %v3793_v41, %s3711_s22 }
 0x73b   : > { %2103 = vrot.lane.b32.xlu1 %v3793_v41, %s3712_s23 }
 0x73f   : > { %2176 = vrot.lane.b32.xlu1 %v3801_v50, %s3711_s22 }
 0x741   : > { %2109 = vrot.lane.b32.xlu0 %v3791_v38, %s3711_s22 }
 0x743   : > { %2174 = vrot.lane.b32.xlu1 %v3799_v48, %s3712_s23 }
 0x745   : > { %2036 = vrot.lane.b32.xlu0 %v3783_v28, %s3712_s23 }
 0x749   : > { %2178 = vrot.lane.b32.xlu0 %v3799_v48, %s3711_s22 }
 0x74d   : > { %2105 = vrot.lane.b32.xlu0 %v3791_v38, %s3712_s23 }
 0x751   : > { %2172 = vrot.lane.b32.xlu0 %v3801_v50, %s3712_s23  ;;  %s4679_s23 = scalar_lea.vmem %s4714_s6, %s2957_s28 }
 0x795   : > { %v1793_v26 = vpop.xlane.xlu1 %1792 }
 0x799   : > { %v1787_v18 = vpop.xlane.xlu1 %1786 }
 0x79d   : > { %v1796_v32 = vpop.xlane.xlu0 %1795 }
 0x79e   : > { %3623 = vrcp.f32 %v1796_v32 }
 0x79f   : > { %v1805_v11 = vpop.xlane.xlu1 %1804  ;;  %3625 = vrcp.f32 %v1787_v18 }
 0x7a0   : > { %3627 = vrcp.f32 %v1793_v26 }
 0x7a1   : > { %v1790_v12 = vpop.xlane.xlu0 %1789 }
 0x7a2   : > { %3629 = vrcp.f32 %v1790_v12 }
 0x7a3   : > { %v1799_v35 = vpop.xlane.xlu1 %1798 }
 0x7a7   : > { %v1817_v19 = vpop.xlane.xlu1 %1816 }
 0x7a8   : > { %v1808_v5 = vpop.xlane.xlu0 %1807 }
 0x7a9   : > { %3631 = vrcp.f32 %v1808_v5 }
 0x7aa   : > { %3633 = vrcp.f32 %v1799_v35 }
 0x7ab   : > { %v3624_v47 = vpop.eup %3623  ;;  %3635 = vrcp.f32 %v1805_v11  ;;  %v1811_v32 = vpop.xlane.xlu1 %1810 }
 0x7ac   : > { %v1802_v21 = vpop.xlane.xlu0 %1801  ;;  %v3626_v10 = vpop.eup %3625  ;;  %v1836_v4 = vmul.f32 %v3624_v47, %v4305_v30 }
 0x7ad   : > { %3637 = vrcp.f32 %v1802_v21  ;;  %v3628_v17 = vpop.eup %3627  ;;  %v1833_v26 = vmul.f32 %v3626_v10, %v4300_v52 }
 0x7ae   : > { %v1835_v12 = vmul.f32 %v3628_v17, %v4293_v15 }
 0x7af   : > { %v3630_v13 = vpop.eup %3629 }
 0x7b0   : > { %v1820_v29 = vpop.xlane.xlu0 %1819  ;;  %v1834_v18 = vmul.f32 %v3630_v13, %v4308_v8  ;;  %v1846_v35 = vpack.c.bf16 %v1836_v4, %v1835_v12 }
 0x7b1   : > { %3639 = vrcp.f32 %v1820_v29 }
 0x7b2   : > { %v1845_v5 = vpack.c.bf16 %v1834_v18, %v1833_v26  ;;  %3641 = vrcp.f32 %v1811_v32 }
 0x7b3   : > { %3643 = vrcp.f32 %v1817_v19 }
 0x7b4   : > { %v1814_v11 = vpop.xlane.xlu0 %1813  ;;  %3279 = vmatprep.mubr.msk.bf16.mxu1 %vm297_vm0, %v1845_v5 }
 0x7b5   : > { %3645 = vrcp.f32 %v1814_v11  ;;  %3280 = vmatmul.mubr.msk.bf16.vlgmr.msra.gmra.mxu1 %vm297_vm0, %v1846_v35 }
 0x7b6   : > { %3284 = vmatpush3.bf16.msra.mxu1 %v4321_v1  ;;  %v3632_v30 = vpop.eup %3631  ;;  %v2035_v1 = vpop.permute.xlu1 %2034 }
 0x7b7   : > { %3285 = vmatprep.subr.bf16.mxu1 %v1913_v16  ;;  %v3634_v52 = vpop.eup %3633  ;;  %v1840_v4 = vmul.f32 %v3632_v30, %v4328_v34  ;;  %v2049_v30 = vsel %vm425_vm1, %v4364_v51, 0 }
 0x7b8   : > { %v2110_v47 = vpop.permute.xlu0 %2109  ;;  %v3636_v13 = vpop.eup %3635  ;;  %v1837_v15 = vmul.f32 %v3634_v52, %v4319_v27 }
 0x7b9   : > { %3383 = vmatprep.subr.msk.bf16.mxu0 %vm425_vm1, %v2110_v47  ;;  %v1839_v19 = vmul.f32 %v3636_v13, %v4313_v24  ;;  %v2121_v52 = vsel %vm425_vm1, %v2110_v47, 0 }
 0x7ba   : > { %v3638_v29 = vpop.eup %3637  ;;  %3286 = vmatpush3.bf16.msra.mxu1 %v1913_v16  ;;  %v2052_v16 = vsel %vm425_vm1, %v2041_v2, 0 }
 0x7bb   : > { %3381 = vmatprep.subr.msk.bf16.mxu1 %vm425_vm1, %v2041_v2  ;;  %v1838_v8 = vmul.f32 %v3638_v29, %v4334_v22  ;;  %v1848_v10 = vpack.c.bf16 %v1840_v4, %v1839_v19  ;;  %v2108_v22 = vpop.permute.xlu1 %2107 }
 0x7bc   : > { %v2037_v32 = vpop.permute.xlu0 %2036 }
 0x7bd   : > { %v1847_v21 = vpack.c.bf16 %v1838_v8, %v1837_v15 }
 0x7be   : > { %v3640_v17 = vpop.eup %3639 }
 0x7bf   : > { %3287 = vmatprep.mubr.msk.bf16.mxu1 %vm297_vm0, %v1847_v21  ;;  %v3642_v26 = vpop.eup %3641  ;;  %v1844_v24 = vmul.f32 %v3640_v17, %v4342_v25  ;;  %v2104_v25 = vpop.permute.xlu1 %2103 }
 0x7c0   : > { %3288 = vmatmul.mubr.msk.bf16.vlgmr.msra.gmra.mxu1 %vm297_vm0, %v1848_v10  ;;  %v3644_v34 = vpop.eup %3643  ;;  %v1841_v18 = vmul.f32 %v3642_v26, %v4336_v3  ;;  %v2179_v2 = vpop.permute.xlu0 %2178  ;;  %v2118_v3 = vsel %vm425_vm1, %v2108_v22, 0 }
 0x7c1   : > { %3300 = vmatpush3.bf16.xpose.msra.mxu1 %v2052_v16  ;;  %3303 = vmatprep.mubr.msk.bf16.mxu1 %vm425_vm1, %v2035_v1  ;;  %v1843_v5 = vmul.f32 %v3644_v34, %v4326_v23 }
 0x7c2   : > { %v3646_v27 = vpop.eup %3645  ;;  %3382 = vmatprep.subr.msk.bf16.mxu1 %vm425_vm1, %v4364_v51 }
 0x7c3   : > { %v1842_v12 = vmul.f32 %v3646_v27, %v4346_v20  ;;  %v1850_v11 = vpack.c.bf16 %v1844_v24, %v1843_v5  ;;  %v2190_v20 = vsel %vm425_vm1, %v2179_v2, 0  ;;  %v2177_v51 = vpop.permute.xlu1 %2176  ;;  %v417_v5 = vld [vmem:[%s4711_s3 + $0x70] sm:$0xff] }
 0x7c4   : > { %v2106_v23 = vpop.permute.xlu0 %2105  ;;  %v2187_v13 = vsel %vm425_vm1, %v2177_v51, 0 }
 0x7c5   : > { %v1849_v35 = vpack.c.bf16 %v1842_v12, %v1841_v18 }
 0x7c7   : > { %3295 = vmatprep.mubr.msk.bf16.mxu0 %vm297_vm0, %v1849_v35  ;;  %v2175_v29 = vpop.permute.xlu1 %2174 }
 0x7c8   : > { %3296 = vmatmul.mubr.msk.bf16.vlgmr.msra.gmra.mxu0 %vm297_vm0, %v1850_v11  ;;  %v2173_v47 = vpop.permute.xlu0 %2172  ;;  %v415_v11 = vld [vmem:[%s4711_s3 + $0x60] sm:$0xff] }
 0x7c9   : > { %3302 = vmatpush3.bf16.xpose.msra.mxu1 %v2049_v30  ;;  %3308 = vmatpush3.bf16.xpose.msra.mxu0 %v2121_v52 }
 0x7ca   : > { %3384 = vmatprep.subr.msk.bf16.mxu0 %vm425_vm1, %v2108_v22  ;;  %3311 = vmatprep.mubr.msk.bf16.mxu0 %vm425_vm1, %v2104_v25 }
 0x7cb   : > { %3385 = vmatprep.subr.msk.bf16.mxu1 %vm425_vm1, %v2179_v2 }
 0x7d0   : > { %3304 = vmatmul.mubr.msk.bf16.vlgmr.msra.gmra.mxu1 %vm425_vm1, %v2037_v32 }
 0x7d1   : > { %3310 = vmatpush3.bf16.xpose.msra.mxu0 %v2118_v3  ;;  %3316 = vmatpush3.bf16.xpose.msra.mxu1 %v2190_v20  ;;  %v418_v3 = vld [vmem:[%s4711_s3 + $0x78] sm:$0xff] }
 0x7d2   : > { %3319 = vmatprep.mubr.msk.bf16.mxu1 %vm425_vm1, %v2173_v47  ;;  %3386 = vmatprep.subr.msk.bf16.mxu1 %vm425_vm1, %v2177_v51  ;;  %v416_v51 = vld [vmem:[%s4711_s3 + $0x68] sm:$0xff] }
 0x7d8   : > { %3312 = vmatmul.mubr.msk.bf16.vlgmr.msra.gmra.mxu0 %vm425_vm1, %v2106_v23 }
 0x7d9   : > { %3318 = vmatpush3.bf16.xpose.msra.mxu1 %v2187_v13 }
 0x7e0   : > { %3320 = vmatmul.mubr.msk.bf16.vlgmr.msra.gmra.mxu1 %vm425_vm1, %v2175_v29 }
 0x875   : > { %v4405_v4 = vpop.f32.mrf.mxu1 }
 0x877   : > { %v4407_v15 = vpop.f32.mrf.mxu1 }
 0x879   : > { %v4409_v8 = vpop.f32.mrf.mxu1 }
 0x87b   : > { %v4413_v1 = vpop.f32.mrf.mxu1 }
 0x880   : > { %v4417_v10 = vpop.f32.mrf.mxu1 }
 0x882   : > { %v4419_v17 = vpop.f32.mrf.mxu1 }
 0x884   : > { %v4421_v32 = vpop.f32.mrf.mxu1 }
 0x886   : > { %v4425_v16 = vpop.f32.mrf.mxu1 }
 0x888   : > { %v4429_v27 = vpop.f32.mrf.mxu0 }
 0x88a   : > { %v4431_v24 = vpop.f32.mrf.mxu0 }
 0x88c   : > { %v4433_v22 = vpop.f32.mrf.mxu0 }
 0x88e   : > { %v4437_v12 = vpop.f32.mrf.mxu0 }
 0x890   : > { %v3305_v35 = vpop.f32.mrf.mxu1 }
 0x891   : > { %v2243_v30 = vadd.f32 %v3305_v35, %v417_v5 }
 0x892   : > { %v2088_v52 = vpop.f32.mrf.mxu1 }
 0x893   : > { %v2241_v25 = vadd.f32 %v2088_v52, %v415_v11  ;;  %v2259_v23 = vsel %vm297_vm0, %v2243_v30, -inf }
 0x894   : > { %2260 = vmax.xlane.f32.xlu0 %v2259_v23  ;;  %v3306_v20 = vpop.f32.mrf.mxu1 }
 0x895   : > { %v2244_v13 = vadd.f32 %v3306_v20, %v418_v3  ;;  %v2253_v2 = vsel %vm297_vm0, %v2241_v25, -inf }
 0x896   : > { %v2091_v47 = vpop.f32.mrf.mxu1 }
 0x897   : > { %v2242_v29 = vadd.f32 %v2091_v47, %v416_v51  ;;  %v2262_v34 = vsel %vm297_vm0, %v2244_v13, -inf }
 0x898   : > { %2254 = vmax.xlane.f32.xlu0 %v2253_v2  ;;  %v3313_v35 = vpop.f32.mrf.mxu0 }
 0x899   : > { %v2247_v52 = vadd.f32 %v3313_v35, %v417_v5  ;;  %v2256_v18 = vsel %vm297_vm0, %v2242_v29, -inf }
 0x89a   : > { %2257 = vmax.xlane.f32.xlu1 %v2256_v18  ;;  %v2157_v23 = vpop.f32.mrf.mxu0 }
 0x89b   : > { %v2245_v44 = vadd.f32 %v2157_v23, %v415_v11  ;;  %v2271_v26 = vsel %vm297_vm0, %v2247_v52, -inf }
 0x89c   : > { %2263 = vmax.xlane.f32.xlu0 %v2262_v34  ;;  %v3314_v21 = vpop.f32.mrf.mxu0 }
 0x89d   : > { %v2248_v19 = vadd.f32 %v3314_v21, %v418_v3  ;;  %v2265_v35 = vsel %vm297_vm0, %v2245_v44, -inf }
 0x89e   : > { %2272 = vmax.xlane.f32.xlu1 %v2271_v26  ;;  %v2160_v53 = vpop.f32.mrf.mxu0 }
 0x89f   : > { %v4458_v20 = vadd.f32 %v2160_v53, %v416_v51  ;;  %v2274_v23 = vsel %vm297_vm0, %v2248_v19, -inf }
 0x8a0   : > { %v3321_v47 = vpop.f32.mrf.mxu1 }
 0x8a1   : > { %v2251_v2 = vadd.f32 %v3321_v47, %v417_v5  ;;  %v2268_v18 = vsel %vm297_vm0, %v4458_v20, -inf }
 0x8a2   : > { %2266 = vmax.xlane.f32.xlu1 %v2265_v35  ;;  %2269 = vmax.xlane.f32.xlu0 %v2268_v18  ;;  %v2226_v37 = vpop.f32.mrf.mxu1 }
 0x8a3   : > { %v4463_v0 = vadd.f32 %v2226_v37, %v415_v11  ;;  %v2283_v26 = vsel %vm297_vm0, %v2251_v2, -inf }
 0x8a4   : > { %v3322_v34 = vpop.f32.mrf.mxu1 }
 0x8a5   : > { %v4469_v5 = vadd.f32 %v3322_v34, %v418_v3  ;;  %v2277_v47 = vsel %vm297_vm0, %v4463_v0, -inf }
 0x8a6   : > { %2275 = vmax.xlane.f32.xlu0 %v2274_v23  ;;  %2284 = vmax.xlane.f32.xlu1 %v2283_v26  ;;  %v2229_v53 = vpop.f32.mrf.mxu1 }
 0x8a7   : > { %v4467_v21 = vadd.f32 %v2229_v53, %v416_v51  ;;  %v2286_v37 = vsel %vm297_vm0, %v4469_v5, -inf }
 0x8a9   : > { %v2280_v35 = vsel %vm297_vm0, %v4467_v21, -inf }
 0x8aa   : > { %2278 = vmax.xlane.f32.xlu1 %v2277_v47  ;;  %2281 = vmax.xlane.f32.xlu0 %v2280_v35 }
 0x8ae   : > { %2287 = vmax.xlane.f32.xlu0 %v2286_v37 }
 0x8bb   : > { %2393 = vrot.lane.b32.xlu1 %v3783_v28, %s3713_s10 }
 0x8bf   : > { %2454 = vrot.lane.b32.xlu1 %v3791_v38, %s3713_s10 }
 0x8c3   : > { %2452 = vrot.lane.b32.xlu1 %v3793_v41, %s3713_s10 }
 0x8c4   : > { %2391 = vrot.lane.b32.xlu0 %v3785_v31, %s3713_s10 }
 0x91d   : > { %v2261_v11 = vpop.xlane.xlu0 %2260 }
 0x91e   : > { %v2291_v3 = vsub.f32 %v2243_v30, %v2261_v11 }
 0x920   : > { %v2305_v51 = vmul.f32 1.442695, %v2291_v3 }
 0x921   : > { %v2255_v18 = vpop.xlane.xlu0 %2254 }
 0x922   : > { %3647 = vpow2.f32 %v2305_v51  ;;  %v2289_v34 = vsub.f32 %v2241_v25, %v2255_v18 }
 0x923   : > { %v2258_v23 = vpop.xlane.xlu1 %2257 }
 0x924   : > { %v2301_v26 = vmul.f32 1.442695, %v2289_v34  ;;  %v2290_v53 = vsub.f32 %v2242_v29, %v2258_v23 }
 0x925   : > { %v2264_v47 = vpop.xlane.xlu0 %2263 }
 0x926   : > { %3649 = vpow2.f32 %v2301_v26  ;;  %v2292_v28 = vsub.f32 %v2244_v13, %v2264_v47  ;;  %v2303_v35 = vmul.f32 1.442695, %v2290_v53 }
 0x927   : > { %v2273_v38 = vpop.xlane.xlu1 %2272 }
 0x928   : > { %v2307_v37 = vmul.f32 1.442695, %v2292_v28  ;;  %v2295_v14 = vsub.f32 %v2247_v52, %v2273_v38 }
 0x92a   : > { %3651 = vpow2.f32 %v2307_v37  ;;  %v2313_v41 = vmul.f32 1.442695, %v2295_v14 }
 0x92b   : > { %3653 = vpow2.f32 %v2303_v35  ;;  %v2267_v31 = vpop.xlane.xlu1 %2266  ;;  %v2270_v62 = vpop.xlane.xlu0 %2269 }
 0x92c   : > { %3655 = vpow2.f32 %v2313_v41  ;;  %v2293_v30 = vsub.f32 %v2245_v44, %v2267_v31  ;;  %v2294_v25 = vsub.f32 %v4458_v20, %v2270_v62 }
 0x92e   : > { %v2309_v11 = vmul.f32 1.442695, %v2293_v30  ;;  %v2311_v26 = vmul.f32 1.442695, %v2294_v25 }
 0x92f   : > { %v4485_v3 = vpop.eup %3647  ;;  %v2285_v29 = vpop.xlane.xlu1 %2284 }
 0x930   : > { %v2276_v51 = vpop.xlane.xlu0 %2275  ;;  %3657 = vpow2.f32 %v2309_v11  ;;  %v2299_v13 = vsub.f32 %v2251_v2, %v2285_v29  ;;  %v2331_v52 = vsel %vm297_vm0, %v4485_v3, 0.0 }
 0x931   : > { %v2296_v18 = vsub.f32 %v2248_v19, %v2276_v51  ;;  %2332 = vadd.xlane.f32.xlu1 %v2331_v52 }
 0x932   : > { %v2321_v14 = vmul.f32 1.442695, %v2299_v13 }
 0x933   : > { %v2315_v34 = vmul.f32 1.442695, %v2296_v18  ;;  %v4490_v23 = vpop.eup %3649  ;;  %v2279_v44 = vpop.xlane.xlu1 %2278 }
 0x934   : > { %v2282_v53 = vpop.xlane.xlu0 %2281  ;;  %3659 = vpow2.f32 %v2321_v14  ;;  %v2297_v47 = vsub.f32 %v4463_v0, %v2279_v44  ;;  %v2325_v62 = vsel %vm297_vm0, %v4490_v23, 0.0 }
 0x935   : > { %3661 = vpow2.f32 %v2315_v34  ;;  %2326 = vadd.xlane.f32.xlu1 %v2325_v62  ;;  %v2298_v2 = vsub.f32 %v4467_v21, %v2282_v53 }
 0x936   : > { %v2317_v19 = vmul.f32 1.442695, %v2297_v47  ;;  %3663 = vpow2.f32 %v2311_v26 }
 0x937   : > { %v4495_v20 = vpop.eup %3651  ;;  %v2394_v28 = vpop.permute.xlu1 %2393  ;;  %v2319_v21 = vmul.f32 1.442695, %v2298_v2 }
 0x938   : > { %v2288_v35 = vpop.xlane.xlu0 %2287  ;;  %v4498_v38 = vpop.eup %3653  ;;  %3665 = vpow2.f32 %v2317_v19  ;;  %3323 = vmatprep.subr.bf16.mxu0 %v2394_v28  ;;  %v2334_v0 = vsel %vm297_vm0, %v4495_v20, 0.0 }
 0x939   : > { %v2300_v37 = vsub.f32 %v4469_v5, %v2288_v35  ;;  %v4503_v41 = vpop.eup %3655  ;;  %3324 = vmatpush3.bf16.msra.mxu0 %v2394_v28  ;;  %2335 = vadd.xlane.f32.xlu0 %v2334_v0  ;;  %v2328_v5 = vsel %vm297_vm0, %v4498_v38, 0.0  ;;  %v4718_v28 = vpack.i.bf16 %v4201_v46, %v4197_v40  ;;  %v4719_v35 = vpack.i.bf16 %v4409_v8, %v4405_v4 }
 0x93a   : > { %v2343_v30 = vsel %vm297_vm0, %v4503_v41, 0.0  ;;  %v4722_v40 = vpack.i.bf16 %v4205_v36, %v4199_v42  ;;  %v4723_v46 = vpack.i.bf16 %v4413_v1, %v4407_v15 }
 0x93b   : > { %v2323_v31 = vmul.f32 1.442695, %v2300_v37  ;;  %2344 = vadd.xlane.f32.xlu1 %v2343_v30  ;;  %v4511_v29 = vpop.permute.xlu1 %2454  ;;  %v4720_v37 = vpack.i.bf16 %v4213_v45, %v4209_v39  ;;  %v4724_v39 = vpack.i.bf16 %v4217_v33, %v4211_v49 }
 0x93c   : > { %v2392_v11 = vpop.permute.xlu0 %2391 }
 0x93d   : > { %3667 = vpow2.f32 %v2323_v31  ;;  %3325 = vmatprep.subr.bf16.mxu0 %v2392_v11  ;;  %v4509_v25 = vpop.eup %3657  ;;  %2329 = vadd.xlane.f32.xlu0 %v2328_v5 }
 0x93e   : > { %3326 = vmatpush3.bf16.msra.mxu0 %v2392_v11  ;;  %v2337_v51 = vsel %vm297_vm0, %v4509_v25, 0.0  ;;  %3669 = vpow2.f32 %v2319_v21 }
 0x93f   : > { %3331 = vmatprep.subr.bf16.mxu0 %v4511_v29  ;;  %2338 = vadd.xlane.f32.xlu1 %v2337_v51  ;;  %v2453_v45 = vpop.permute.xlu1 %2452 }
 0x941   : > { %v4516_v13 = vpop.eup %3659 }
 0x942   : > { %v4518_v18 = vpop.eup %3661  ;;  %v2355_v52 = vsel %vm297_vm0, %v4516_v13, 0.0 }
 0x943   : > { %2356 = vadd.xlane.f32.xlu1 %v2355_v52  ;;  %v2346_v14 = vsel %vm297_vm0, %v4518_v18, 0.0  ;;  %v4524_v34 = vpop.eup %3663 }
 0x944   : > { %2347 = vadd.xlane.f32.xlu0 %v2346_v14  ;;  %v2340_v53 = vsel %vm297_vm0, %v4524_v34, 0.0 }
 0x945   : > { %v4526_v26 = vpop.eup %3665 }
 0x946   : > { %v2349_v44 = vsel %vm297_vm0, %v4526_v26, 0.0 }
 0x947   : > { %2350 = vadd.xlane.f32.xlu1 %v2349_v44 }
 0x948   : > { %2341 = vadd.xlane.f32.xlu0 %v2340_v53 }
 0x94a   : > { %v4532_v47 = vpop.eup %3667 }
 0x94b   : > { %v2358_v62 = vsel %vm297_vm0, %v4532_v47, 0.0  ;;  %v4536_v19 = vpop.eup %3669 }
 0x94c   : > { %2359 = vadd.xlane.f32.xlu0 %v2358_v62  ;;  %v2352_v2 = vsel %vm297_vm0, %v4536_v19, 0.0 }
 0x950   : > { %2353 = vadd.xlane.f32.xlu0 %v2352_v2 }
 0x958   : > { %2513 = vrot.lane.b32.xlu1 %v3801_v50, %s3713_s10  ;;  %v4721_v50 = vpack.i.bf16 %v4421_v32, %v4417_v10 }
 0x95c   : > { %3415 = vrot.lane.b32.xlu1 %v4718_v28, %s3714_s11 }
 0x960   : > { %3425 = vrot.lane.b32.xlu1 %v4719_v35, %s3715_s12 }
 0x964   : > { %3435 = vrot.lane.b32.xlu1 %v4720_v37, %s3714_s11 }
 0x966   : > { %2515 = vrot.lane.b32.xlu0 %v3799_v48, %s3713_s10  ;;  %v4725_v48 = vpack.i.bf16 %v4425_v16, %v4419_v17 }
 0x968   : > { %3445 = vrot.lane.b32.xlu1 %v4721_v50, %s3715_s12 }
 0x96a   : > { %3410 = vrot.lane.b32.xlu0 %v4722_v40, %s3714_s11 }
 0x96e   : > { %3420 = vrot.lane.b32.xlu0 %v4723_v46, %s3715_s12 }
 0x972   : > { %3430 = vrot.lane.b32.xlu0 %v4724_v39, %s3714_s11 }
 0x976   : > { %3440 = vrot.lane.b32.xlu0 %v4725_v48, %s3715_s12 }
 0x9ba   : > { %v2333_v4 = vpop.xlane.xlu1 %2332 }
 0x9be   : > { %v2327_v8 = vpop.xlane.xlu1 %2326 }
 0x9c2   : > { %v2336_v42 = vpop.xlane.xlu0 %2335 }
 0x9c3   : > { %3671 = vrcp.f32 %v2336_v42 }
 0x9c4   : > { %v2345_v36 = vpop.xlane.xlu1 %2344  ;;  %3673 = vrcp.f32 %v2327_v8  ;;  %v3501_v8 = vld [vmem:[%s4712_s4 + $0x8] sm:$0xff]  }
 0x9c5   : > { %3675 = vrcp.f32 %v2333_v4 }
 0x9c6   : > { %v2330_v15 = vpop.xlane.xlu0 %2329 }
 0x9c7   : > { %3677 = vrcp.f32 %v2330_v15 }
 0x9c8   : > { %v2339_v1 = vpop.xlane.xlu1 %2338 }
 0x9cc   : > { %v2357_v32 = vpop.xlane.xlu1 %2356 }
 0x9cd   : > { %v2348_v10 = vpop.xlane.xlu0 %2347 }
 0x9ce   : > { %3679 = vrcp.f32 %v2348_v10  ;;  %v4726_v10 = vpack.i.bf16 %v4225_v9, %v4221_v54 }
 0x9cf   : > { %3681 = vrcp.f32 %v2339_v1 }
 0x9d0   : > { %v3672_v49 = vpop.eup %3671  ;;  %3683 = vrcp.f32 %v2345_v36  ;;  %v2351_v30 = vpop.xlane.xlu1 %2350 }
 0x9d1   : > { %v2342_v33 = vpop.xlane.xlu0 %2341  ;;  %v3674_v17 = vpop.eup %3673  ;;  %v2376_v31 = vmul.f32 %v3672_v49, %v4495_v20  ;;  %v4727_v49 = vpack.i.bf16 %v4229_v7, %v4223_v43  ;;  %v4729_v43 = vpack.i.bf16 %v4437_v12, %v4431_v24 }
 0x9d2   : > { %3685 = vrcp.f32 %v2342_v33  ;;  %v3676_v16 = vpop.eup %3675  ;;  %v2373_v11 = vmul.f32 %v3674_v17, %v4490_v23 }
 0x9d3   : > { %v2375_v51 = vmul.f32 %v3676_v16, %v4485_v3 }
 0x9d4   : > { %v3678_v0 = vpop.eup %3677  ;;  %v2514_v62 = vpop.permute.xlu1 %2513 }
 0x9d5   : > { %v2360_v21 = vpop.xlane.xlu0 %2359  ;;  %v2374_v5 = vmul.f32 %v3678_v0, %v4498_v38  ;;  %v2386_v14 = vpack.c.bf16 %v2376_v31, %v2375_v51 }
 0x9d6   : > { %3687 = vrcp.f32 %v2360_v21  ;;  %v4728_v21 = vpack.i.bf16 %v4433_v22, %v4429_v27 }
 0x9d7   : > { %v2385_v52 = vpack.c.bf16 %v2374_v5, %v2373_v11  ;;  %3689 = vrcp.f32 %v2351_v30 }
 0x9d8   : > { %3691 = vrcp.f32 %v2357_v32  ;;  %v3416_v5 = vpop.permute.xlu1 %3415 }
 0x9d9   : > { %v2354_v44 = vpop.xlane.xlu0 %2353  ;;  %3327 = vmatprep.mubr.msk.bf16.mxu0 %vm297_vm0, %v2385_v52  ;;  %v3417_v22 = vunpack.i.l.bf16 %v3416_v5 }
 0x9da   : > { %3693 = vrcp.f32 %v2354_v44  ;;  %3328 = vmatmul.mubr.msk.bf16.vlgmr.msra.gmra.mxu0 %vm297_vm0, %v2386_v14 }
 0x9db   : > { %3332 = vmatpush3.bf16.msra.mxu0 %v4511_v29  ;;  %v3680_v20 = vpop.eup %3679 }
 0x9dc   : > { %3333 = vmatprep.subr.bf16.mxu0 %v2453_v45  ;;  %v3682_v23 = vpop.eup %3681  ;;  %v2380_v2 = vmul.f32 %v3680_v20, %v4518_v18  ;;  %v3426_v52 = vpop.permute.xlu1 %3425 }
 0x9dd   : > { %v2516_v53 = vpop.permute.xlu0 %2515  ;;  %v3684_v38 = vpop.eup %3683  ;;  %v2377_v28 = vmul.f32 %v3682_v23, %v4509_v25  ;;  %v3418_v23 = vunpack.i.h.bf16 %v3416_v5 }
 0x9de   : > { %3339 = vmatprep.subr.bf16.mxu1 %v2516_v53  ;;  %v2379_v37 = vmul.f32 %v3684_v38, %v4503_v41  ;;  %v3427_v38 = vunpack.i.l.bf16 %v3426_v52 }
 0x9df   : > { %v3686_v3 = vpop.eup %3685  ;;  %3334 = vmatpush3.bf16.msra.mxu0 %v2453_v45  ;;  %3340 = vmatpush3.bf16.msra.mxu1 %v2516_v53  ;;  %v3428_v53 = vunpack.i.h.bf16 %v3426_v52  ;;  %v2721_v12 = vsel %vm425_vm1, %v4003_v58, %v3418_v23 }
 0x9e0   : > { %3341 = vmatprep.subr.bf16.mxu1 %v2514_v62  ;;  %v2378_v35 = vmul.f32 %v3686_v3, %v4524_v34  ;;  %v2388_v50 = vpack.c.bf16 %v2380_v2, %v2379_v37  ;;  %3347 = vmatprep.subr.bf16.mxu0 %v3501_v8  ;;  %v3436_v44 = vpop.permute.xlu1 %3435  ;;  %v2720_v37 = vsel %vm425_vm1, %v3997_v55, %v3417_v22 }
 0x9e1   : > { %v3411_v51 = vpop.permute.xlu0 %3410 }
 0x9e2   : > { %v2387_v29 = vpack.c.bf16 %v2378_v35, %v2377_v28  ;;  %v3412_v24 = vunpack.i.l.bf16 %v3411_v51 }
 0x9e3   : > { %3342 = vmatpush3.bf16.msra.mxu1 %v2514_v62  ;;  %v3688_v40 = vpop.eup %3687  ;;  %v3413_v62 = vunpack.i.h.bf16 %v3411_v51 }
 0x9e4   : > { %3335 = vmatprep.mubr.msk.bf16.mxu0 %vm297_vm0, %v2387_v29  ;;  %v3690_v46 = vpop.eup %3689  ;;  %v2384_v18 = vmul.f32 %v3688_v40, %v4532_v47  ;;  %v3446_v27 = vpop.permute.xlu1 %3445  ;;  %v2733_v40 = vsel %vm2730_vm2, %v2720_v37, %v3427_v38  ;;  %v2718_v58 = vsel %vm425_vm1, %v3999_v56, %v3412_v24 }
 0x9e5   : > { %3336 = vmatmul.mubr.msk.bf16.vlgmr.msra.gmra.mxu0 %vm297_vm0, %v2388_v50  ;;  %v3692_v39 = vpop.eup %3691  ;;  %v2381_v45 = vmul.f32 %v3690_v46, %v4526_v26  ;;  %v3502_v26 = vld [vmem:[%s4712_s4] sm:$0xff]   ;;  %v3421_v14 = vpop.permute.xlu0 %3420  ;;  %v2734_v46 = vsel %vm2730_vm2, %v2721_v12, %v3428_v53  ;;  %v3448_v56 = vunpack.i.h.bf16 %v3446_v27 }
 0x9e6   : > { %v2383_v34 = vmul.f32 %v3692_v39, %v4516_v13  ;;  %3348 = vmatpush3.bf16.msra.mxu0 %v3501_v8  ;;  %v3423_v2 = vunpack.i.h.bf16 %v3421_v14  ;;  %v3422_v28 = vunpack.i.l.bf16 %v3421_v14 }
 0x9e7   : > { %v3694_v48 = vpop.eup %3693  ;;  %3349 = vmatprep.subr.bf16.mxu0 %v3502_v26 }
 0x9e8   : > { %v2382_v25 = vmul.f32 %v3694_v48, %v4536_v19  ;;  %v2390_v4 = vpack.c.bf16 %v2384_v18, %v2383_v34  ;;  %v2719_v48 = vsel %vm425_vm1, %v4007_v60, %v3413_v62 }
 0x9e9   : > { %v3431_v20 = vpop.permute.xlu0 %3430  ;;  %v2732_v55 = vsel %vm2730_vm2, %v2719_v48, %v3423_v2 }
 0x9ea   : > { %v2389_v41 = vpack.c.bf16 %v2382_v25, %v2381_v45  ;;  %3350 = vmatpush3.bf16.msra.mxu0 %v3502_v26  ;;  %v2731_v25 = vsel %vm2730_vm2, %v2718_v58, %v3422_v28 }
 0x9ec   : > { %3343 = vmatprep.mubr.msk.bf16.mxu1 %vm297_vm0, %v2389_v41 }
 0x9ed   : > { %3344 = vmatmul.mubr.msk.bf16.vlgmr.msra.gmra.mxu1 %vm297_vm0, %v2390_v4  ;;  %v3441_v3 = vpop.permute.xlu0 %3440 }
 0xa9a   : > { %v3329_v47 = vpop.f32.mrf.mxu0 }
 0xa9c   : > { %v2437_v13 = vpop.f32.mrf.mxu0 }
 0xa9e   : > { %v3330_v19 = vpop.f32.mrf.mxu0 }
 0xa9f   : > { %v3449_v42 = vpack.i.bf16 %v3330_v19, %v3329_v47  ;;  %v3437_v19 = vunpack.i.l.bf16 %v3436_v44 }
 0xaa0   : > { %v2440_v36 = vpop.f32.mrf.mxu0 }
 0xaa1   : > { %v3454_v15 = vpack.i.bf16 %v2440_v36, %v2437_v13  ;;  %3450 = vrot.lane.b32.xlu1 %v3449_v42, %s3716_s17  ;;  %v3438_v13 = vunpack.i.h.bf16 %v3436_v44  ;;  %v3447_v42 = vunpack.i.l.bf16 %v3446_v27 }
 0xaa3   : > { %3455 = vrot.lane.b32.xlu0 %v3454_v15, %s3716_s17  ;;  %v3433_v15 = vunpack.i.h.bf16 %v3431_v20 }
 0xaa5   : > { %v3337_v1 = vpop.f32.mrf.mxu0  ;;  %3465 = vrot.lane.b32.xlu1 %v4726_v10, %s3714_s11  ;;  %v3443_v10 = vunpack.i.h.bf16 %v3441_v3 }
 0xaa7   : > { %v2498_v32 = vpop.f32.mrf.mxu0  ;;  %3460 = vrot.lane.b32.xlu0 %v4727_v49, %s3714_s11 }
 0xaa9   : > { %v3338_v33 = vpop.f32.mrf.mxu0 }
 0xaaa   : > { %v3469_v17 = vpack.i.bf16 %v3338_v33, %v3337_v1  ;;  %v3432_v1 = vunpack.i.l.bf16 %v3431_v20  ;;  %v2725_v33 = vsel %vm425_vm1, %v4009_v61, %v3438_v13 }
 0xaab   : > { %v2501_v16 = vpop.f32.mrf.mxu0 }
 0xaac   : > { %v3474_v0 = vpack.i.bf16 %v2501_v16, %v2498_v32  ;;  %3470 = vrot.lane.b32.xlu1 %v3469_v17, %s3716_s17  ;;  %v3442_v32 = vunpack.i.l.bf16 %v3441_v3  ;;  %v2724_v17 = vsel %vm425_vm1, %v4001_v57, %v3437_v19 }
 0xaad   : > { %v3345_v31 = vpop.f32.mrf.mxu1 }
 0xaae   : > { %3475 = vrot.lane.b32.xlu0 %v3474_v0, %s3716_s17 }
 0xaaf   : > { %v2559_v30 = vpop.f32.mrf.mxu1 }
 0xab0   : > { %3485 = vrot.lane.b32.xlu1 %v4728_v21, %s3715_s12 }
 0xab1   : > { %v3346_v54 = vpop.f32.mrf.mxu1 }
 0xab2   : > { %v3494_v9 = vpack.i.bf16 %v3346_v54, %v3345_v31  ;;  %3480 = vrot.lane.b32.xlu0 %v4729_v43, %s3715_s12  ;;  %v2737_v31 = vsel %vm2730_vm2, %v2724_v17, %v3447_v42  ;;  %v2723_v54 = vsel %vm425_vm1, %v4013_v63, %v3433_v15 }
 0xab3   : > { %v2562_v7 = vpop.f32.mrf.mxu1 }
 0xab4   : > { %v3489_v11 = vpack.i.bf16 %v2562_v7, %v2559_v30  ;;  %3495 = vrot.lane.b32.xlu1 %v3494_v9, %s3716_s17  ;;  %v2738_v30 = vsel %vm2730_vm2, %v2725_v33, %v3448_v56  ;;  %v2722_v9 = vsel %vm425_vm1, %v4005_v59, %v3432_v1 }
 0xab5   : > { %v2735_v61 = vsel %vm2730_vm2, %v2722_v9, %v3442_v32 }
 0xab6   : > { %3490 = vrot.lane.b32.xlu0 %v3489_v11, %s3716_s17  ;;  %v2736_v11 = vsel %vm2730_vm2, %v2723_v54, %v3443_v10 }
 0xb13   : > { %v3451_v35 = vpop.permute.xlu1 %3450 }
 0xb14   : > { %v3453_v29 = vunpack.i.h.bf16 %v3451_v35  ;;  %v3452_v50 = vunpack.i.l.bf16 %v3451_v35  ;;  %v4730_v35 = vld [vmem:[#allocation2_spill] sm:$0xff] }
 0xb15   : > { %v3456_v39 = vpop.permute.xlu0 %3455 }
 0xb16   : > { %v3458_v18 = vunpack.i.h.bf16 %v3456_v39  ;;  %v3457_v45 = vunpack.i.l.bf16 %v3456_v39  ;;  %v2747_v34 = vsel %vm2743_vm3, %v2734_v46, %v3453_v29  ;;  %v2746_v41 = vsel %vm2743_vm3, %v2733_v40, %v3452_v50  ;;  %v4731_v29 = vld [vmem:[#allocation4_spill] sm:$0xff]  ;;  %v4732_v40 = vld [vmem:[#allocation3_spill] sm:$0xff] }
 0xb17   : > { %v2757_v47 = vpack.c.bf16 %v2747_v34, %v2746_v41  ;;  %v3466_v60 = vpop.permute.xlu1 %3465 }
 0xb18   : > { %v2744_v4 = vsel %vm2743_vm3, %v2731_v25, %v3457_v45  ;;  %v2745_v8 = vsel %vm2743_vm3, %v2732_v55, %v3458_v18  ;;  %v3468_v52 = vunpack.i.h.bf16 %v3466_v60  ;;  %v3467_v63 = vunpack.i.l.bf16 %v3466_v60 }
 0xb19   : > { %v2756_v26 = vpack.c.bf16 %v2745_v8, %v2744_v4  ;;  %v3461_v36 = vpop.permute.xlu0 %3460 }
 0xb1a   : > { %v3463_v20 = vunpack.i.h.bf16 %v3461_v36  ;;  %v3462_v23 = vunpack.i.l.bf16 %v3461_v36  ;;  %v2729_v28 = vsel %vm425_vm1, %v4025_v6, %v3468_v52  ;;  %v2728_v37 = vsel %vm425_vm1, %v4730_v35, %v3467_v63 }
 0xb1b   : > { %3351 = vmatprep.mubr.msk.bf16.mxu0 %vm297_vm0, %v2756_v26 }
 0xb1c   : > { %3352 = vmatmul.mubr.msk.bf16.vlgmr.msra.gmra.mxu0 %vm297_vm0, %v2757_v47  ;;  %v2727_v50 = vsel %vm425_vm1, %v4731_v29, %v3463_v20  ;;  %v2726_v46 = vsel %vm425_vm1, %v4732_v40, %v3462_v23  ;;  %v3016_v47 = vld [vmem:[%s4713_s5] ss:$0 sm:$0xff] }
 0xb1e   : > { %v3471_v49 = vpop.permute.xlu1 %3470 }
 0xb1f   : > { %v3473_v16 = vunpack.i.h.bf16 %v3471_v49  ;;  %v3472_v0 = vunpack.i.l.bf16 %v3471_v49 }
 0xb20   : > { %v3476_v21 = vpop.permute.xlu0 %3475 }
 0xb21   : > { %v3478_v43 = vunpack.i.h.bf16 %v3476_v21  ;;  %v3477_v7 = vunpack.i.l.bf16 %v3476_v21  ;;  %v2751_v57 = vsel %vm2743_vm3, %v2738_v30, %v3473_v16  ;;  %v2750_v5 = vsel %vm2743_vm3, %v2737_v31, %v3472_v0 }
 0xb22   : > { %v3486_v51 = vpop.permute.xlu1 %3485  ;;  %v2759_v22 = vpack.c.bf16 %v2751_v57, %v2750_v5 }
 0xb23   : > { %v2748_v14 = vsel %vm2743_vm3, %v2735_v61, %v3477_v7  ;;  %v2749_v44 = vsel %vm2743_vm3, %v2736_v11, %v3478_v43  ;;  %v3488_v53 = vunpack.i.h.bf16 %v3486_v51  ;;  %v3487_v38 = vunpack.i.l.bf16 %v3486_v51 }
 0xb24   : > { %v2758_v59 = vpack.c.bf16 %v2749_v44, %v2748_v14  ;;  %v3481_v27 = vpop.permute.xlu0 %3480 }
 0xb25   : > { %v3483_v3 = vunpack.i.h.bf16 %v3481_v27  ;;  %v3482_v62 = vunpack.i.l.bf16 %v3481_v27  ;;  %v2742_v48 = vsel %vm2730_vm2, %v2729_v28, %v3488_v53  ;;  %v2741_v58 = vsel %vm2730_vm2, %v2728_v37, %v3487_v38 }
 0xb26   : > { %v3496_v24 = vpop.permute.xlu1 %3495  ;;  %3355 = vmatprep.mubr.msk.bf16.mxu0 %vm297_vm0, %v2758_v59 }
 0xb27   : > { %v3498_v12 = vunpack.i.h.bf16 %v3496_v24  ;;  %v3497_v2 = vunpack.i.l.bf16 %v3496_v24  ;;  %3356 = vmatmul.mubr.msk.bf16.gmra.mxu0 %vm297_vm0, %v2759_v22  ;;  %v2739_v25 = vsel %vm2730_vm2, %v2726_v46, %v3482_v62  ;;  %v2740_v6 = vsel %vm2730_vm2, %v2727_v50, %v3483_v3 }
 0xb28   : > { %v3491_v39 = vpop.permute.xlu0 %3490 }
 0xb29   : > { %v3493_v18 = vunpack.i.h.bf16 %v3491_v39  ;;  %v3492_v45 = vunpack.i.l.bf16 %v3491_v39  ;;  %v2755_v55 = vsel %vm2743_vm3, %v2742_v48, %v3498_v12  ;;  %v2754_v34 = vsel %vm2743_vm3, %v2741_v58, %v3497_v2 }
 0xb2a   : > { %v2761_v26 = vpack.c.bf16 %v2755_v55, %v2754_v34 }
 0xb2b   : > { %v2752_v41 = vsel %vm2743_vm3, %v2739_v25, %v3492_v45  ;;  %v2753_v4 = vsel %vm2743_vm3, %v2740_v6, %v3493_v18 }
 0xb2c   : > { %v2760_v8 = vpack.c.bf16 %v2753_v4, %v2752_v41 }
 0xb2e   : > { %3359 = vmatprep.mubr.msk.bf16.mxu0 %vm297_vm0, %v2760_v8 }
 0xb2f   : > { %3360 = vmatmul.mubr.msk.bf16.gmra.mxu0 %vm297_vm0, %v2761_v26 }
 0xbdc   : > { %v3353_v60 = vpop.f32.mrf.mxu0 }
 0xbdd   : > { %v2846_v13 = vadd.f32 %v3353_v60, %v3016_v47 }
 0xbde   : > { %v2837_v19 = vpop.f32.mrf.mxu0 }
 0xbdf   : > { %2886 = vst.msk [vmem:[%s4679_s23 + $0x10] sm:$0xff] %vm297_vm0, %v2846_v13  ;;  %v2838_v56 = vadd.f32 %v3016_v47, %v2837_v19 }
 0xbe0   : > { %v3354_v42 = vpop.f32.mrf.mxu0 }
 0xbe1   : > { %2884 = vst.msk [vmem:[%s4679_s23] sm:$0xff] %vm297_vm0, %v2838_v56  ;;  %v2849_v36 = vadd.f32 %v3354_v42, %v3016_v47 }
 0xbe2   : > { %v2840_v15 = vpop.f32.mrf.mxu0 }
 0xbe3   : > { %2887 = vst.msk [vmem:[%s4679_s23 + $0x18] sm:$0xff] %vm297_vm0, %v2849_v36  ;;  %v2841_v1 = vadd.f32 %v3016_v47, %v2840_v15 }
 0xbe5   : > { %2885 = vst.msk [vmem:[%s4679_s23 + $0x8] sm:$0xff] %vm297_vm0, %v2841_v1 }
 0xbe7   : > { %v3357_v10 = vpop.f32.mrf.mxu0 }
 0xbe8   : > { %v2862_v32 = vadd.f32 %v3357_v10, %v3016_v47 }
 0xbe9   : > { %v2853_v49 = vpop.f32.mrf.mxu0 }
 0xbea   : > { %2890 = vst.msk [vmem:[%s4679_s23 + $0x30] sm:$0xff] %vm297_vm0, %v2862_v32  ;;  %v2854_v33 = vadd.f32 %v3016_v47, %v2853_v49 }
 0xbeb   : > { %v3358_v17 = vpop.f32.mrf.mxu0 }
 0xbec   : > { %2888 = vst.msk [vmem:[%s4679_s23 + $0x20] sm:$0xff] %vm297_vm0, %v2854_v33  ;;  %v2865_v16 = vadd.f32 %v3358_v17, %v3016_v47 }
 0xbed   : > { %v2856_v0 = vpop.f32.mrf.mxu0 }
 0xbee   : > { %2891 = vst.msk [vmem:[%s4679_s23 + $0x38] sm:$0xff] %vm297_vm0, %v2865_v16  ;;  %v2857_v31 = vadd.f32 %v3016_v47, %v2856_v0 }
 0xbef   : > { %v3361_v30 = vpop.f32.mrf.mxu0 }
 0xbf0   : > { %2889 = vst.msk [vmem:[%s4679_s23 + $0x28] sm:$0xff] %vm297_vm0, %v2857_v31  ;;  %v2878_v21 = vadd.f32 %v3361_v30, %v3016_v47 }
 0xbf1   : > { %v2869_v54 = vpop.f32.mrf.mxu0 }
 0xbf2   : > { %2894 = vst.msk [vmem:[%s4679_s23 + $0x50] sm:$0xff] %vm297_vm0, %v2878_v21  ;;  %v2870_v9 = vadd.f32 %v3016_v47, %v2869_v54 }
 0xbf3   : > { %v3362_v43 = vpop.f32.mrf.mxu0 }
 0xbf4   : > { %2892 = vst.msk [vmem:[%s4679_s23 + $0x40] sm:$0xff] %vm297_vm0, %v2870_v9  ;;  %v2881_v7 = vadd.f32 %v3362_v43, %v3016_v47 }
 0xbf5   : > { %v2872_v61 = vpop.f32.mrf.mxu0 }
 0xbf6   : > { %2895 = vst.msk [vmem:[%s4679_s23 + $0x58] sm:$0xff] %vm297_vm0, %v2881_v7  ;;  %v2873_v11 = vadd.f32 %v3016_v47, %v2872_v61 }
 0xbf8   : > { %2893 = vst.msk [vmem:[%s4679_s23 + $0x48] sm:$0xff] %vm297_vm0, %v2873_v11 }
 0xbf9 PF: > { %s16_s21 = sadd.s32 1, %s3701_s21  }
 0xbfa   : > { %p13_p4 = scmp.ge.s32.totalorder %s16_s21, 4  }
 0xbfc   :  { %15 = sbr.rel (!%p13_p4) target bundleno = 1 (0x1), region = 74 }

</bundles_post_ra>
